<compile_context>
chip_gen: v7x
topology: tpu7x:2x2x1
jax: 0.10.0
libtpu: 0.0.40
codegen_flags: <defaults>
</compile_context>

<pallas_src>
import functools

import jax
import jax.numpy as jnp
from jax.experimental import pallas as pl
from jax.experimental.pallas import tpu as pltpu


# ----------------------------------------------------------------------------- kernel
def _adaatt_kernel(
    fake_ref, hout_ref, conv_ref, conv_emb_ref,
    w_fr_ref, b_fr_ref, w_ho_ref, b_ho_ref,
    w_fre_ref, b_fre_ref, w_hoe_ref, b_hoe_ref,
    w_alpha_ref, w_att2h_ref, b_att2h_ref,
    out_ref,
    fr_sc, hol_sc, hoe_sc, m_sc, l_sc, acc_sc,
    *, att_size, act_dtype,
):
    f32 = jnp.float32
    a_step = pl.program_id(1)
    TB, TA, Dp = conv_ref.shape

    # ---- per-batch-tile projections + online-softmax init (first A step only) -------
    @pl.when(a_step == 0)
    def _init():
        fr = jnp.maximum(
            jnp.dot(fake_ref[...], w_fr_ref[...], preferred_element_type=f32)
            + b_fr_ref[...], 0.0)                                   # ReLU (dropout=id)
        hol = jnp.tanh(
            jnp.dot(hout_ref[...], w_ho_ref[...], preferred_element_type=f32)
            + b_ho_ref[...])                                        # Tanh (dropout=id)
        fre = jnp.dot(fr, w_fre_ref[...], preferred_element_type=f32) + b_fre_ref[...]
        hoe = jnp.dot(hol, w_hoe_ref[...], preferred_element_type=f32) + b_hoe_ref[...]
        fr_sc[...] = fr
        hol_sc[...] = hol
        hoe_sc[...] = hoe
        # Fake-region slot seeds the online softmax.
        # b_alpha is omitted: a constant added to every logit cancels in the softmax.
        s_fake = jnp.sum(jnp.tanh(fre + hoe) * w_alpha_ref[...], axis=-1, keepdims=True)
        m_sc[...] = s_fake                                          # running max
        l_sc[...] = jnp.ones_like(s_fake)                           # exp(s_fake - m) = 1
        acc_sc[...] = fr                                            # fake slot readout

    # ---- this A tile: alpha logits + online-softmax accumulation --------------------
    hoe = hoe_sc[...]
    wa = w_alpha_ref[...]                                           # (1, Dp) f32
    # tanh in act_dtype (bf16 on v6e/v7x halves EUP/vreg traffic; default f32 = v5e safe)
    hA = jnp.tanh(conv_emb_ref[...].astype(act_dtype)
                  + hoe.astype(act_dtype)[:, None, :])              # (TB, TA, Dp)
    # VPU multiply + lane reduce instead of an M=1 batched MXU matmul.
    s = jnp.sum(hA.astype(f32) * wa[None, :, :], axis=-1)           # (TB, TA)
    if att_size % TA != 0:                                          # mask padded A slots
        slot = a_step * TA + jax.lax.broadcasted_iota(jnp.int32, (TB, TA), 1)
        s = jnp.where(slot < att_size, s, -1e30)

    m_prev = m_sc[...]
    m_new = jnp.maximum(m_prev, jnp.max(s, axis=-1, keepdims=True)) # (TB, 1)
    corr = jnp.exp(m_prev - m_new)
    p = jnp.exp(s - m_new)                                          # (TB, TA)
    l_sc[...] = corr * l_sc[...] + jnp.sum(p, axis=-1, keepdims=True)
    # Weighted conv readout: VPU multiply + sublane reduce (not an M=1 matmul).
    acc_sc[...] = corr * acc_sc[...] + jnp.sum(
        p[:, :, None] * conv_ref[...].astype(f32), axis=1)
    m_sc[...] = m_new

    # ---- finalize: normalize, add hol, att2h projection + tanh (last A step) --------
    @pl.when(a_step == pl.num_programs(1) - 1)
    def _finalize():
        vis = acc_sc[...] * pl.reciprocal(l_sc[...], approx=True)
        atten_out = vis + hol_sc[...]
        h = jnp.tanh(jnp.dot(atten_out, w_att2h_ref[...], preferred_element_type=f32)
                     + b_att2h_ref[...])
        out_ref[...] = h.astype(out_ref.dtype)


# ----------------------------------------------------------------------------- helpers
def _round_up(x, m):
    return ((x + m - 1) // m) * m


def _default_vmem_budget():
    # ~3/4 of physical VMEM: ~96 MiB on v5e/v6e (128 MiB), ~48 MiB on v7x (64 MiB/TC).
    try:
        cap = pltpu.get_tpu_info().vmem_capacity_bytes
    except Exception:
        cap = 64 * 1024 * 1024   # conservative fallback (v7x per-TC size)
    return int((cap * 3) // 4)


def _choose_tiles(B, A, Dp, conv_itemsize, weight_bytes, budget):
    """Pick (batch_tile, att_tile) so streamed tiles + intermediates + weights fit."""
    TA = min(_round_up(A, 8), 128)
    per_row = (2 * 2 * TA * Dp * conv_itemsize   # conv + conv_emb, double-buffered DMA
               + 3 * TA * Dp * 4                 # f32 in-kernel temporaries (hA, p*conv)
               + 8 * Dp * 4)                     # fr/hol/hoe/acc scratch + row IO
    avail = max(budget - weight_bytes, per_row * 8)
    TB = int(avail // per_row)
    TB = max(8, min((TB // 8) * 8, 256, _round_up(B, 8)))
    return TB, TA


# ----------------------------------------------------------------------------- wrapper
def adaatt_attention(h_out, fake_region, conv_feat, conv_feat_embed, params, *,
                     conv_dtype=jnp.bfloat16, act_dtype=jnp.float32,
                     weight_dtype=jnp.float32,
                     batch_tile=None, att_tile=None, vmem_budget_bytes=None):
    B, D = h_out.shape
    conv_feat = conv_feat.reshape(B, -1, D)               # view(-1, att_size, rnn_size)
    A = conv_feat.shape[1]
    conv_feat_embed = conv_feat_embed.reshape(B, A, -1)   # view(-1, att_size, att_hid)
    assert conv_feat_embed.shape[-1] == D and fake_region.shape == (B, D), \
        "AdaAtt_attention requires rnn_size == input_encoding_size == att_hid_size"
    for k in ("w_fr", "w_fre", "w_ho", "w_hoe", "w_att2h"):
        assert params[k].shape == (D, D), f"{k} must be ({D},{D})"

    f32 = jnp.float32
    Dp = _round_up(D, 128)                                 # lane-dense feature dim

    if vmem_budget_bytes is None:
        vmem_budget_bytes = _default_vmem_budget()
    w_item = jnp.dtype(weight_dtype).itemsize
    weight_bytes = 2 * (5 * Dp * Dp * w_item + 7 * Dp * 4)  # resident consts (2 buffers)

    TB_auto, TA_auto = _choose_tiles(B, A, Dp, jnp.dtype(conv_dtype).itemsize,
                                     weight_bytes, vmem_budget_bytes)
    TB = TB_auto if batch_tile is None else batch_tile
    TA = TA_auto if att_tile is None else att_tile
    TB = max(8, _round_up(min(TB, _round_up(B, 8)), 8))
    TA = max(8, _round_up(min(TA, _round_up(A, 8)), 8))
    B_pad = _round_up(B, TB)
    A_pad = _round_up(A, TA)

    # ---- input preparation (no-op if the caller pre-padded / pre-cast; for decode
    # loops prepare conv/conv_emb ONCE outside the loop — they are time-step constant).
    def _prep2(x):                                         # (B, D) -> (B_pad, Dp) f32
        x = x.astype(f32)
        if x.shape != (B_pad, Dp):
            x = jnp.pad(x, ((0, B_pad - x.shape[0]), (0, Dp - x.shape[1])))
        return x

    def _prep3(x):                             # (B, A, D) -> (B_pad, A_pad, Dp) stream
        x = x.astype(conv_dtype)
        if x.shape != (B_pad, A_pad, Dp):
            x = jnp.pad(x, ((0, B_pad - x.shape[0]), (0, A_pad - x.shape[1]),
                            (0, Dp - x.shape[2])))
        return x

    def _prep_w(w):                                        # (D, D) -> (Dp, Dp)
        w = w.astype(f32)
        if w.shape != (Dp, Dp):
            w = jnp.pad(w, ((0, Dp - w.shape[0]), (0, Dp - w.shape[1])))
        return w.astype(weight_dtype)

    def _prep_b(b):                                        # (1, D) -> (1, Dp) f32
        b = b.reshape(1, -1).astype(f32)
        if b.shape != (1, Dp):
            b = jnp.pad(b, ((0, 0), (0, Dp - b.shape[1])))
        return b

    fake_p, hout_p = _prep2(fake_region), _prep2(h_out)
    conv_p, conv_emb_p = _prep3(conv_feat), _prep3(conv_feat_embed)

    w_fr, w_ho = _prep_w(params["w_fr"]), _prep_w(params["w_ho"])
    w_fre, w_hoe = _prep_w(params["w_fre"]), _prep_w(params["w_hoe"])
    w_att2h = _prep_w(params["w_att2h"])
    b_fr, b_ho = _prep_b(params["b_fr"]), _prep_b(params["b_ho"])
    b_fre, b_hoe = _prep_b(params["b_fre"]), _prep_b(params["b_hoe"])
    b_att2h = _prep_b(params["b_att2h"])
    w_alpha = _prep_b(params["w_alpha"])                   # (1, Dp) f32, VPU operand
    # b_alpha intentionally dropped: it cancels under the softmax.

    grid = (B_pad // TB, A_pad // TA)                      # batch parallel, A reduction
    io_map = lambda i, a: (i, 0)
    conv_map = lambda i, a: (i, a, 0)
    const = lambda i, a: (0, 0)

    grid_spec = pltpu.PrefetchScalarGridSpec(
        num_scalar_prefetch=0,
        grid=grid,
        in_specs=[
            pl.BlockSpec((TB, Dp), io_map),                # fake_region
            pl.BlockSpec((TB, Dp), io_map),                # h_out
            pl.BlockSpec((TB, TA, Dp), conv_map),          # conv_feat (streamed)
            pl.BlockSpec((TB, TA, Dp), conv_map),          # conv_feat_embed (streamed)
            pl.BlockSpec((Dp, Dp), const),                 # w_fr
            pl.BlockSpec((1, Dp), const),                  # b_fr
            pl.BlockSpec((Dp, Dp), const),                 # w_ho
            pl.BlockSpec((1, Dp), const),                  # b_ho
            pl.BlockSpec((Dp, Dp), const),                 # w_fre
            pl.BlockSpec((1, Dp), const),                  # b_fre
            pl.BlockSpec((Dp, Dp), const),                 # w_hoe
            pl.BlockSpec((1, Dp), const),                  # b_hoe
            pl.BlockSpec((1, Dp), const),                  # w_alpha
            pl.BlockSpec((Dp, Dp), const),                 # w_att2h
            pl.BlockSpec((1, Dp), const),                  # b_att2h
        ],
        out_specs=pl.BlockSpec((TB, Dp), io_map),
        scratch_shapes=[
            pltpu.VMEM((TB, Dp), f32),                     # fr
            pltpu.VMEM((TB, Dp), f32),                     # hol
            pltpu.VMEM((TB, Dp), f32),                     # hoe
            pltpu.VMEM((TB, 1), f32),                      # m  (online-softmax max)
            pltpu.VMEM((TB, 1), f32),                      # l  (online-softmax denom)
            pltpu.VMEM((TB, Dp), f32),                     # acc (unnormalized readout)
        ],
    )

    kernel = functools.partial(_adaatt_kernel, att_size=A, act_dtype=act_dtype)
    out = pl.pallas_call(
        kernel,
        out_shape=jax.ShapeDtypeStruct((B_pad, Dp), f32),
        grid_spec=grid_spec,
        compiler_params=pltpu.CompilerParams(
            dimension_semantics=("parallel", "arbitrary"),  # batch || , A = reduction
            vmem_limit_bytes=int(vmem_budget_bytes),        # same budget used for tiles
        ),
    )(fake_p, hout_p, conv_p, conv_emb_p,
      w_fr, b_fr, w_ho, b_ho, w_fre, b_fre, w_hoe, b_hoe,
      w_alpha, w_att2h, b_att2h)
    return out[:B, :D]


# ----------------------------------------------------------------------------- reference
def adaatt_attention_reference(h_out, fake_region, conv_feat, conv_feat_embed, p):
    """Pure-JAX transliteration of the PyTorch forward (eval mode)."""
    B, D = h_out.shape
    conv_feat = conv_feat.reshape(B, -1, D)
    A = conv_feat.shape[1]
    conv_feat_embed = conv_feat_embed.reshape(B, A, D)
    fr = jax.nn.relu(fake_region @ p["w_fr"] + p["b_fr"])
    fre = fr @ p["w_fre"] + p["b_fre"]
    hol = jnp.tanh(h_out @ p["w_ho"] + p["b_ho"])
    hoe = hol @ p["w_hoe"] + p["b_hoe"]
    txt = jnp.broadcast_to(hoe[:, None, :], (B, A + 1, D))
    img_all = jnp.concatenate([fr[:, None, :], conv_feat], axis=1)
    img_all_embed = jnp.concatenate([fre[:, None, :], conv_feat_embed], axis=1)
    hA = jnp.tanh(img_all_embed + txt)
    hAflat = hA.reshape(-1, D) @ p["w_alpha"].T + p["b_alpha"]
    PI = jax.nn.softmax(hAflat.reshape(B, A + 1), axis=-1)
    vis = jnp.einsum("ba,bad->bd", PI, img_all)
    atten_out = vis + hol
    return jnp.tanh(atten_out @ p["w_att2h"] + p["b_att2h"])


if __name__ == "__main__":
    # Small shapes exercising every path: B=12 (batch padding), A=12 (A padding +
    # in-kernel slot masking), D=32 (feature padding to 128).
    B, A, D = 12, 12, 32
    key = jax.random.PRNGKey(0)
    ks = jax.random.split(key, 16)
    s = 0.1

    params = {
        "w_fr":     jax.random.normal(ks[0],  (D, D), jnp.float32) * s,
        "b_fr":     jax.random.normal(ks[1],  (1, D), jnp.float32) * s,
        "w_fre":    jax.random.normal(ks[2],  (D, D), jnp.float32) * s,
        "b_fre":    jax.random.normal(ks[3],  (1, D), jnp.float32) * s,
        "w_ho":     jax.random.normal(ks[4],  (D, D), jnp.float32) * s,
        "b_ho":     jax.random.normal(ks[5],  (1, D), jnp.float32) * s,
        "w_hoe":    jax.random.normal(ks[6],  (D, D), jnp.float32) * s,
        "b_hoe":    jax.random.normal(ks[7],  (1, D), jnp.float32) * s,
        "w_alpha":  jax.random.normal(ks[8],  (1, D), jnp.float32) * s,
        "b_alpha":  jax.random.normal(ks[9],  (1, 1), jnp.float32) * s,
        "w_att2h":  jax.random.normal(ks[10], (D, D), jnp.float32) * s,
        "b_att2h":  jax.random.normal(ks[11], (1, D), jnp.float32) * s,
    }

    h_out           = jax.random.normal(ks[12], (B, D), jnp.float32)
    fake_region     = jax.random.normal(ks[13], (B, D), jnp.float32)
    conv_feat       = jax.random.normal(ks[14], (B, A, D), jnp.float32)
    conv_feat_embed = jax.random.normal(ks[15], (B, A, D), jnp.float32)

    ref = adaatt_attention_reference(h_out, fake_region, conv_feat, conv_feat_embed,
                                     params)

    # (1) f32-streamed, explicit small tiles -> grid (2, 2): exercises the batch grid,
    #     the A-tiled online softmax, and masking of the padded attention slots.
    out = adaatt_attention(h_out, fake_region, conv_feat, conv_feat_embed, params,
                           conv_dtype=jnp.float32, batch_tile=8, att_tile=8)
    out = jax.block_until_ready(out)
    assert out.shape == (B, D)
    # tolerance accounts for pl.reciprocal(approx=True) in the softmax normalization
    assert jnp.allclose(out, ref, atol=5e-3, rtol=5e-3), "f32 kernel mismatch vs ref"

    # (2) default production path: bf16-streamed conv tensors, auto tile/VMEM sizing.
    #     (act_dtype=jnp.bfloat16 is the additional v6e/v7x lever for the big tanh.)
    out_bf16 = adaatt_attention(h_out, fake_region, conv_feat, conv_feat_embed, params)
    out_bf16 = jax.block_until_ready(out_bf16)
    assert jnp.allclose(out_bf16, ref, atol=5e-2, rtol=5e-2), "bf16 kernel mismatch"

    print("KERNEL_OK")
</pallas_src>

<mosaic_0001>
module attributes {stable_mosaic.version = 11 : i64} {
  func.func @_adaatt_kernel(%arg0: i32, %arg1: i32, %arg2: memref<8x128xf32, #tpu.memory_space<vmem>>, %arg3: memref<8x128xf32, #tpu.memory_space<vmem>>, %arg4: memref<8x8x128xf32, #tpu.memory_space<vmem>>, %arg5: memref<8x8x128xf32, #tpu.memory_space<vmem>>, %arg6: memref<128x128xf32, #tpu.memory_space<vmem>>, %arg7: memref<1x128xf32, #tpu.memory_space<vmem>>, %arg8: memref<128x128xf32, #tpu.memory_space<vmem>>, %arg9: memref<1x128xf32, #tpu.memory_space<vmem>>, %arg10: memref<128x128xf32, #tpu.memory_space<vmem>>, %arg11: memref<1x128xf32, #tpu.memory_space<vmem>>, %arg12: memref<128x128xf32, #tpu.memory_space<vmem>>, %arg13: memref<1x128xf32, #tpu.memory_space<vmem>>, %arg14: memref<1x128xf32, #tpu.memory_space<vmem>>, %arg15: memref<128x128xf32, #tpu.memory_space<vmem>>, %arg16: memref<1x128xf32, #tpu.memory_space<vmem>>, %arg17: memref<8x128xf32, #tpu.memory_space<vmem>>, %arg18: memref<8x128xf32, #tpu.memory_space<vmem>>, %arg19: memref<8x128xf32, #tpu.memory_space<vmem>>, %arg20: memref<8x128xf32, #tpu.memory_space<vmem>>, %arg21: memref<8x1xf32, #tpu.memory_space<vmem>>, %arg22: memref<8x1xf32, #tpu.memory_space<vmem>>, %arg23: memref<8x128xf32, #tpu.memory_space<vmem>>) attributes {dimension_semantics = [#tpu.dimension_semantics<parallel>, #tpu.dimension_semantics<arbitrary>], iteration_bounds = array<i64: 2, 2>, scalar_prefetch = 0 : i64, scratch_operands = 6 : i64, tpu.core_type = #tpu.core_type<tc>, window_params = [{transform_indices = @transform_0, window_bounds = array<i64: 8, 128>}, {transform_indices = @transform_1, window_bounds = array<i64: 8, 128>}, {transform_indices = @transform_2, window_bounds = array<i64: 8, 8, 128>}, {transform_indices = @transform_3, window_bounds = array<i64: 8, 8, 128>}, {pipeline_mode = #tpu.pipeline_mode<synchronous>, transform_indices = @transform_4, window_bounds = array<i64: 128, 128>}, {pipeline_mode = #tpu.pipeline_mode<synchronous>, transform_indices = @transform_5, window_bounds = array<i64: 1, 128>}, {pipeline_mode = #tpu.pipeline_mode<synchronous>, transform_indices = @transform_6, window_bounds = array<i64: 128, 128>}, {pipeline_mode = #tpu.pipeline_mode<synchronous>, transform_indices = @transform_7, window_bounds = array<i64: 1, 128>}, {pipeline_mode = #tpu.pipeline_mode<synchronous>, transform_indices = @transform_8, window_bounds = array<i64: 128, 128>}, {pipeline_mode = #tpu.pipeline_mode<synchronous>, transform_indices = @transform_9, window_bounds = array<i64: 1, 128>}, {pipeline_mode = #tpu.pipeline_mode<synchronous>, transform_indices = @transform_10, window_bounds = array<i64: 128, 128>}, {pipeline_mode = #tpu.pipeline_mode<synchronous>, transform_indices = @transform_11, window_bounds = array<i64: 1, 128>}, {pipeline_mode = #tpu.pipeline_mode<synchronous>, transform_indices = @transform_12, window_bounds = array<i64: 1, 128>}, {pipeline_mode = #tpu.pipeline_mode<synchronous>, transform_indices = @transform_13, window_bounds = array<i64: 128, 128>}, {pipeline_mode = #tpu.pipeline_mode<synchronous>, transform_indices = @transform_14, window_bounds = array<i64: 1, 128>}, {transform_indices = @transform_15, window_bounds = array<i64: 8, 128>}]} {
    %c0_i32 = arith.constant 0 : i32
    %0 = arith.cmpi eq, %arg1, %c0_i32 : i32
    %1 = arith.extui %0 : i1 to i32
    %c0_i32_0 = arith.constant 0 : i32
    %2 = arith.cmpi ne, %1, %c0_i32_0 : i32
    scf.if %2 {
      %c0_27 = arith.constant 0 : index
      %c0_28 = arith.constant 0 : index
      %51 = vector.load %arg2[%c0_27, %c0_28] : memref<8x128xf32, #tpu.memory_space<vmem>>, vector<8x128xf32>
      %c0_29 = arith.constant 0 : index
      %c0_30 = arith.constant 0 : index
      %52 = vector.load %arg6[%c0_29, %c0_30] : memref<128x128xf32, #tpu.memory_space<vmem>>, vector<128x128xf32>
      %cst_31 = arith.constant dense<0.000000e+00> : vector<8x128xf32>
      %53 = tpu.matmul %51, %52, %cst_31 {dimension_numbers = #tpu.dot_dimension_numbers<[1], [0], [0], [1], [0, 0, 1, 1], [], []>} : vector<8x128xf32>, vector<128x128xf32>, vector<8x128xf32> -> vector<8x128xf32>
      %c0_32 = arith.constant 0 : index
      %c0_33 = arith.constant 0 : index
      %54 = vector.load %arg7[%c0_32, %c0_33] : memref<1x128xf32, #tpu.memory_space<vmem>>, vector<1x128xf32>
      %55 = vector.broadcast %54 : vector<1x128xf32> to vector<8x128xf32>
      %56 = arith.addf %53, %55 : vector<8x128xf32>
      %cst_34 = arith.constant 0.000000e+00 : f32
      %57 = vector.broadcast %cst_34 : f32 to vector<8x128xf32>
      %58 = arith.maximumf %56, %57 : vector<8x128xf32>
      %c0_35 = arith.constant 0 : index
      %c0_36 = arith.constant 0 : index
      %59 = vector.load %arg3[%c0_35, %c0_36] : memref<8x128xf32, #tpu.memory_space<vmem>>, vector<8x128xf32>
      %c0_37 = arith.constant 0 : index
      %c0_38 = arith.constant 0 : index
      %60 = vector.load %arg8[%c0_37, %c0_38] : memref<128x128xf32, #tpu.memory_space<vmem>>, vector<128x128xf32>
      %cst_39 = arith.constant dense<0.000000e+00> : vector<8x128xf32>
      %61 = tpu.matmul %59, %60, %cst_39 {dimension_numbers = #tpu.dot_dimension_numbers<[1], [0], [0], [1], [0, 0, 1, 1], [], []>} : vector<8x128xf32>, vector<128x128xf32>, vector<8x128xf32> -> vector<8x128xf32>
      %c0_40 = arith.constant 0 : index
      %c0_41 = arith.constant 0 : index
      %62 = vector.load %arg9[%c0_40, %c0_41] : memref<1x128xf32, #tpu.memory_space<vmem>>, vector<1x128xf32>
      %63 = vector.broadcast %62 : vector<1x128xf32> to vector<8x128xf32>
      %64 = arith.addf %61, %63 : vector<8x128xf32>
      %65 = math.tanh %64 : vector<8x128xf32>
      %c0_42 = arith.constant 0 : index
      %c0_43 = arith.constant 0 : index
      %66 = vector.load %arg10[%c0_42, %c0_43] : memref<128x128xf32, #tpu.memory_space<vmem>>, vector<128x128xf32>
      %cst_44 = arith.constant dense<0.000000e+00> : vector<8x128xf32>
      %67 = tpu.matmul %58, %66, %cst_44 {dimension_numbers = #tpu.dot_dimension_numbers<[1], [0], [0], [1], [0, 0, 1, 1], [], []>} : vector<8x128xf32>, vector<128x128xf32>, vector<8x128xf32> -> vector<8x128xf32>
      %c0_45 = arith.constant 0 : index
      %c0_46 = arith.constant 0 : index
      %68 = vector.load %arg11[%c0_45, %c0_46] : memref<1x128xf32, #tpu.memory_space<vmem>>, vector<1x128xf32>
      %69 = vector.broadcast %68 : vector<1x128xf32> to vector<8x128xf32>
      %70 = arith.addf %67, %69 : vector<8x128xf32>
      %c0_47 = arith.constant 0 : index
      %c0_48 = arith.constant 0 : index
      %71 = vector.load %arg12[%c0_47, %c0_48] : memref<128x128xf32, #tpu.memory_space<vmem>>, vector<128x128xf32>
      %cst_49 = arith.constant dense<0.000000e+00> : vector<8x128xf32>
      %72 = tpu.matmul %65, %71, %cst_49 {dimension_numbers = #tpu.dot_dimension_numbers<[1], [0], [0], [1], [0, 0, 1, 1], [], []>} : vector<8x128xf32>, vector<128x128xf32>, vector<8x128xf32> -> vector<8x128xf32>
      %c0_50 = arith.constant 0 : index
      %c0_51 = arith.constant 0 : index
      %73 = vector.load %arg13[%c0_50, %c0_51] : memref<1x128xf32, #tpu.memory_space<vmem>>, vector<1x128xf32>
      %74 = vector.broadcast %73 : vector<1x128xf32> to vector<8x128xf32>
      %75 = arith.addf %72, %74 : vector<8x128xf32>
      %c0_52 = arith.constant 0 : index
      %c0_53 = arith.constant 0 : index
      %76 = vector.load %arg18[%c0_52, %c0_53] : memref<8x128xf32, #tpu.memory_space<vmem>>, vector<8x128xf32>
      tpu.vector_store %arg18[%c0_52, %c0_53], %58 {strides = array<i32>} : memref<8x128xf32, #tpu.memory_space<vmem>>, vector<8x128xf32>,
      %c0_54 = arith.constant 0 : index
      %c0_55 = arith.constant 0 : index
      %77 = vector.load %arg19[%c0_54, %c0_55] : memref<8x128xf32, #tpu.memory_space<vmem>>, vector<8x128xf32>
      tpu.vector_store %arg19[%c0_54, %c0_55], %65 {strides = array<i32>} : memref<8x128xf32, #tpu.memory_space<vmem>>, vector<8x128xf32>,
      %c0_56 = arith.constant 0 : index
      %c0_57 = arith.constant 0 : index
      %78 = vector.load %arg20[%c0_56, %c0_57] : memref<8x128xf32, #tpu.memory_space<vmem>>, vector<8x128xf32>
      tpu.vector_store %arg20[%c0_56, %c0_57], %75 {strides = array<i32>} : memref<8x128xf32, #tpu.memory_space<vmem>>, vector<8x128xf32>,
      %79 = arith.addf %70, %75 : vector<8x128xf32>
      %80 = math.tanh %79 : vector<8x128xf32>
      %c0_58 = arith.constant 0 : index
      %c0_59 = arith.constant 0 : index
      %81 = vector.load %arg14[%c0_58, %c0_59] : memref<1x128xf32, #tpu.memory_space<vmem>>, vector<1x128xf32>
      %82 = vector.broadcast %81 : vector<1x128xf32> to vector<8x128xf32>
      %83 = arith.mulf %80, %82 : vector<8x128xf32>
      %cst_60 = arith.constant dense<0.000000e+00> : vector<8xf32>
      %84 = vector.multi_reduction <add>, %83, %cst_60 [1] : vector<8x128xf32> to vector<8xf32>
      %85 = vector.shape_cast %84 : vector<8xf32> to vector<8x1xf32>
      %c0_61 = arith.constant 0 : index
      %c0_62 = arith.constant 0 : index
      %86 = vector.load %arg21[%c0_61, %c0_62] : memref<8x1xf32, #tpu.memory_space<vmem>>, vector<8x1xf32>
      tpu.vector_store %arg21[%c0_61, %c0_62], %85 {strides = array<i32>} : memref<8x1xf32, #tpu.memory_space<vmem>>, vector<8x1xf32>,
      %cst_63 = arith.constant 1.000000e+00 : f32
      %87 = vector.broadcast %cst_63 : f32 to vector<8x1xf32>
      %c0_64 = arith.constant 0 : index
      %c0_65 = arith.constant 0 : index
      %88 = vector.load %arg22[%c0_64, %c0_65] : memref<8x1xf32, #tpu.memory_space<vmem>>, vector<8x1xf32>
      tpu.vector_store %arg22[%c0_64, %c0_65], %87 {strides = array<i32>} : memref<8x1xf32, #tpu.memory_space<vmem>>, vector<8x1xf32>,
      %c0_66 = arith.constant 0 : index
      %c0_67 = arith.constant 0 : index
      %89 = vector.load %arg23[%c0_66, %c0_67] : memref<8x128xf32, #tpu.memory_space<vmem>>, vector<8x128xf32>
      tpu.vector_store %arg23[%c0_66, %c0_67], %58 {strides = array<i32>} : memref<8x128xf32, #tpu.memory_space<vmem>>, vector<8x128xf32>,
    } else {
    }
    %c0 = arith.constant 0 : index
    %c0_1 = arith.constant 0 : index
    %3 = vector.load %arg20[%c0, %c0_1] : memref<8x128xf32, #tpu.memory_space<vmem>>, vector<8x128xf32>
    %c0_2 = arith.constant 0 : index
    %c0_3 = arith.constant 0 : index
    %4 = vector.load %arg14[%c0_2, %c0_3] : memref<1x128xf32, #tpu.memory_space<vmem>>, vector<1x128xf32>
    %c0_4 = arith.constant 0 : index
    %c0_5 = arith.constant 0 : index
    %c0_6 = arith.constant 0 : index
    %5 = vector.load %arg5[%c0_4, %c0_5, %c0_6] : memref<8x8x128xf32, #tpu.memory_space<vmem>>, vector<8x8x128xf32>
    %6 = vector.shape_cast %3 : vector<8x128xf32> to vector<8x1x128xf32>
    %7 = vector.broadcast %6 : vector<8x1x128xf32> to vector<8x8x128xf32>
    %8 = arith.addf %5, %7 : vector<8x8x128xf32>
    %9 = math.tanh %8 : vector<8x8x128xf32>
    %10 = vector.shape_cast %4 : vector<1x128xf32> to vector<1x1x128xf32>
    %11 = vector.broadcast %10 : vector<1x1x128xf32> to vector<8x8x128xf32>
    %12 = arith.mulf %9, %11 : vector<8x8x128xf32>
    %cst = arith.constant dense<0.000000e+00> : vector<8x8xf32>
    %13 = vector.multi_reduction <add>, %12, %cst [2] : vector<8x8x128xf32> to vector<8x8xf32>
    %c8_i32 = arith.constant 8 : i32
    %14 = arith.muli %arg1, %c8_i32 : i32
    %15 = tpu.iota {dimensions = array<i32: 1>} : vector<8x8xi32>
    %16 = vector.broadcast %14 : i32 to vector<8x8xi32>
    %17 = arith.addi %16, %15 : vector<8x8xi32>
    %c12_i32 = arith.constant 12 : i32
    %18 = vector.broadcast %c12_i32 : i32 to vector<8x8xi32>
    %19 = arith.cmpi slt, %17, %18 : vector<8x8xi32>
    %cst_7 = arith.constant -1.000000e+30 : f32
    %20 = vector.broadcast %cst_7 : f32 to vector<8x8xf32>
    %21 = arith.select %19, %13, %20 : vector<8x8xi1>, vector<8x8xf32>
    %c0_8 = arith.constant 0 : index
    %c0_9 = arith.constant 0 : index
    %22 = vector.load %arg21[%c0_8, %c0_9] : memref<8x1xf32, #tpu.memory_space<vmem>>, vector<8x1xf32>
    %cst_10 = arith.constant dense<0xFF800000> : vector<8xf32>
    %23 = vector.multi_reduction <maximumf>, %21, %cst_10 [1] : vector<8x8xf32> to vector<8xf32>
    %24 = vector.shape_cast %23 : vector<8xf32> to vector<8x1xf32>
    %25 = arith.maximumf %22, %24 : vector<8x1xf32>
    %26 = arith.subf %22, %25 : vector<8x1xf32>
    %27 = math.exp %26 : vector<8x1xf32>
    %28 = vector.broadcast %25 : vector<8x1xf32> to vector<8x8xf32>
    %29 = arith.subf %21, %28 : vector<8x8xf32>
    %30 = math.exp %29 : vector<8x8xf32>
    %c0_11 = arith.constant 0 : index
    %c0_12 = arith.constant 0 : index
    %31 = vector.load %arg22[%c0_11, %c0_12] : memref<8x1xf32, #tpu.memory_space<vmem>>, vector<8x1xf32>
    %32 = arith.mulf %27, %31 : vector<8x1xf32>
    %cst_13 = arith.constant dense<0.000000e+00> : vector<8xf32>
    %33 = vector.multi_reduction <add>, %30, %cst_13 [1] : vector<8x8xf32> to vector<8xf32>
    %34 = vector.shape_cast %33 : vector<8xf32> to vector<8x1xf32>
    %35 = arith.addf %32, %34 : vector<8x1xf32>
    %c0_14 = arith.constant 0 : index
    %c0_15 = arith.constant 0 : index
    %36 = vector.load %arg22[%c0_14, %c0_15] : memref<8x1xf32, #tpu.memory_space<vmem>>, vector<8x1xf32>
    tpu.vector_store %arg22[%c0_14, %c0_15], %35 {strides = array<i32>} : memref<8x1xf32, #tpu.memory_space<vmem>>, vector<8x1xf32>,
    %c0_16 = arith.constant 0 : index
    %c0_17 = arith.constant 0 : index
    %37 = vector.load %arg23[%c0_16, %c0_17] : memref<8x128xf32, #tpu.memory_space<vmem>>, vector<8x128xf32>
    %38 = vector.broadcast %27 : vector<8x1xf32> to vector<8x128xf32>
    %39 = arith.mulf %38, %37 : vector<8x128xf32>
    %40 = vector.shape_cast %30 : vector<8x8xf32> to vector<8x8x1xf32>
    %c0_18 = arith.constant 0 : index
    %c0_19 = arith.constant 0 : index
    %c0_20 = arith.constant 0 : index
    %41 = vector.load %arg4[%c0_18, %c0_19, %c0_20] : memref<8x8x128xf32, #tpu.memory_space<vmem>>, vector<8x8x128xf32>
    %42 = vector.broadcast %40 : vector<8x8x1xf32> to vector<8x8x128xf32>
    %43 = arith.mulf %42, %41 : vector<8x8x128xf32>
    %cst_21 = arith.constant dense<0.000000e+00> : vector<8x128xf32>
    %44 = vector.multi_reduction <add>, %43, %cst_21 [1] : vector<8x8x128xf32> to vector<8x128xf32>
    %45 = arith.addf %39, %44 : vector<8x128xf32>
    %c0_22 = arith.constant 0 : index
    %c0_23 = arith.constant 0 : index
    %46 = vector.load %arg23[%c0_22, %c0_23] : memref<8x128xf32, #tpu.memory_space<vmem>>, vector<8x128xf32>
    tpu.vector_store %arg23[%c0_22, %c0_23], %45 {strides = array<i32>} : memref<8x128xf32, #tpu.memory_space<vmem>>, vector<8x128xf32>,
    %c0_24 = arith.constant 0 : index
    %c0_25 = arith.constant 0 : index
    %47 = vector.load %arg21[%c0_24, %c0_25] : memref<8x1xf32, #tpu.memory_space<vmem>>, vector<8x1xf32>
    tpu.vector_store %arg21[%c0_24, %c0_25], %25 {strides = array<i32>} : memref<8x1xf32, #tpu.memory_space<vmem>>, vector<8x1xf32>,
    %c1_i32 = arith.constant 1 : i32
    %48 = arith.cmpi eq, %arg1, %c1_i32 : i32
    %49 = arith.extui %48 : i1 to i32
    %c0_i32_26 = arith.constant 0 : i32
    %50 = arith.cmpi ne, %49, %c0_i32_26 : i32
    scf.if %50 {
      %c0_27 = arith.constant 0 : index
      %c0_28 = arith.constant 0 : index
      %51 = vector.load %arg23[%c0_27, %c0_28] : memref<8x128xf32, #tpu.memory_space<vmem>>, vector<8x128xf32>
      %c0_29 = arith.constant 0 : index
      %c0_30 = arith.constant 0 : index
      %52 = vector.load %arg22[%c0_29, %c0_30] : memref<8x1xf32, #tpu.memory_space<vmem>>, vector<8x1xf32>
      %53 = tpu.reciprocal %52 {approx = true} : vector<8x1xf32> -> vector<8x1xf32>
      %54 = vector.broadcast %53 : vector<8x1xf32> to vector<8x128xf32>
      %55 = arith.mulf %51, %54 : vector<8x128xf32>
      %c0_31 = arith.constant 0 : index
      %c0_32 = arith.constant 0 : index
      %56 = vector.load %arg19[%c0_31, %c0_32] : memref<8x128xf32, #tpu.memory_space<vmem>>, vector<8x128xf32>
      %57 = arith.addf %55, %56 : vector<8x128xf32>
      %c0_33 = arith.constant 0 : index
      %c0_34 = arith.constant 0 : index
      %58 = vector.load %arg15[%c0_33, %c0_34] : memref<128x128xf32, #tpu.memory_space<vmem>>, vector<128x128xf32>
      %cst_35 = arith.constant dense<0.000000e+00> : vector<8x128xf32>
      %59 = tpu.matmul %57, %58, %cst_35 {dimension_numbers = #tpu.dot_dimension_numbers<[1], [0], [0], [1], [0, 0, 1, 1], [], []>} : vector<8x128xf32>, vector<128x128xf32>, vector<8x128xf32> -> vector<8x128xf32>
      %c0_36 = arith.constant 0 : index
      %c0_37 = arith.constant 0 : index
      %60 = vector.load %arg16[%c0_36, %c0_37] : memref<1x128xf32, #tpu.memory_space<vmem>>, vector<1x128xf32>
      %61 = vector.broadcast %60 : vector<1x128xf32> to vector<8x128xf32>
      %62 = arith.addf %59, %61 : vector<8x128xf32>
      %63 = math.tanh %62 : vector<8x128xf32>
      %c0_38 = arith.constant 0 : index
      %c0_39 = arith.constant 0 : index
      %64 = vector.load %arg17[%c0_38, %c0_39] : memref<8x128xf32, #tpu.memory_space<vmem>>, vector<8x128xf32>
      tpu.vector_store %arg17[%c0_38, %c0_39], %63 {strides = array<i32>} : memref<8x128xf32, #tpu.memory_space<vmem>>, vector<8x128xf32>,
    } else {
    }
    return
  }
  func.func @transform_0(%arg0: i32, %arg1: i32) -> (i32, i32) {
    %c0_i32 = arith.constant 0 : i32
    %c0_i32_0 = arith.constant 0 : i32
    return %arg0, %c0_i32 : i32, i32
  }
  func.func @transform_1(%arg0: i32, %arg1: i32) -> (i32, i32) {
    %c0_i32 = arith.constant 0 : i32
    %c0_i32_0 = arith.constant 0 : i32
    return %arg0, %c0_i32 : i32, i32
  }
  func.func @transform_2(%arg0: i32, %arg1: i32) -> (i32, i32, i32) {
    %c0_i32 = arith.constant 0 : i32
    %c0_i32_0 = arith.constant 0 : i32
    return %arg0, %arg1, %c0_i32 : i32, i32, i32
  }
  func.func @transform_3(%arg0: i32, %arg1: i32) -> (i32, i32, i32) {
    %c0_i32 = arith.constant 0 : i32
    %c0_i32_0 = arith.constant 0 : i32
    return %arg0, %arg1, %c0_i32 : i32, i32, i32
  }
  func.func @transform_4(%arg0: i32, %arg1: i32) -> (i32, i32) {
    %c0_i32 = arith.constant 0 : i32
    %c0_i32_0 = arith.constant 0 : i32
    %c0_i32_1 = arith.constant 0 : i32
    return %c0_i32, %c0_i32_0 : i32, i32
  }
  func.func @transform_5(%arg0: i32, %arg1: i32) -> (i32, i32) {
    %c0_i32 = arith.constant 0 : i32
    %c0_i32_0 = arith.constant 0 : i32
    %c0_i32_1 = arith.constant 0 : i32
    return %c0_i32, %c0_i32_0 : i32, i32
  }
  func.func @transform_6(%arg0: i32, %arg1: i32) -> (i32, i32) {
    %c0_i32 = arith.constant 0 : i32
    %c0_i32_0 = arith.constant 0 : i32
    %c0_i32_1 = arith.constant 0 : i32
    return %c0_i32, %c0_i32_0 : i32, i32
  }
  func.func @transform_7(%arg0: i32, %arg1: i32) -> (i32, i32) {
    %c0_i32 = arith.constant 0 : i32
    %c0_i32_0 = arith.constant 0 : i32
    %c0_i32_1 = arith.constant 0 : i32
    return %c0_i32, %c0_i32_0 : i32, i32
  }
  func.func @transform_8(%arg0: i32, %arg1: i32) -> (i32, i32) {
    %c0_i32 = arith.constant 0 : i32
    %c0_i32_0 = arith.constant 0 : i32
    %c0_i32_1 = arith.constant 0 : i32
    return %c0_i32, %c0_i32_0 : i32, i32
  }
  func.func @transform_9(%arg0: i32, %arg1: i32) -> (i32, i32) {
    %c0_i32 = arith.constant 0 : i32
    %c0_i32_0 = arith.constant 0 : i32
    %c0_i32_1 = arith.constant 0 : i32
    return %c0_i32, %c0_i32_0 : i32, i32
  }
  func.func @transform_10(%arg0: i32, %arg1: i32) -> (i32, i32) {
    %c0_i32 = arith.constant 0 : i32
    %c0_i32_0 = arith.constant 0 : i32
    %c0_i32_1 = arith.constant 0 : i32
    return %c0_i32, %c0_i32_0 : i32, i32
  }
  func.func @transform_11(%arg0: i32, %arg1: i32) -> (i32, i32) {
    %c0_i32 = arith.constant 0 : i32
    %c0_i32_0 = arith.constant 0 : i32
    %c0_i32_1 = arith.constant 0 : i32
    return %c0_i32, %c0_i32_0 : i32, i32
  }
  func.func @transform_12(%arg0: i32, %arg1: i32) -> (i32, i32) {
    %c0_i32 = arith.constant 0 : i32
    %c0_i32_0 = arith.constant 0 : i32
    %c0_i32_1 = arith.constant 0 : i32
    return %c0_i32, %c0_i32_0 : i32, i32
  }
  func.func @transform_13(%arg0: i32, %arg1: i32) -> (i32, i32) {
    %c0_i32 = arith.constant 0 : i32
    %c0_i32_0 = arith.constant 0 : i32
    %c0_i32_1 = arith.constant 0 : i32
    return %c0_i32, %c0_i32_0 : i32, i32
  }
  func.func @transform_14(%arg0: i32, %arg1: i32) -> (i32, i32) {
    %c0_i32 = arith.constant 0 : i32
    %c0_i32_0 = arith.constant 0 : i32
    %c0_i32_1 = arith.constant 0 : i32
    return %c0_i32, %c0_i32_0 : i32, i32
  }
  func.func @transform_15(%arg0: i32, %arg1: i32) -> (i32, i32) {
    %c0_i32 = arith.constant 0 : i32
    %c0_i32_0 = arith.constant 0 : i32
    return %arg0, %c0_i32 : i32, i32
  }
}

</mosaic_0001>

<bundles_post_ra>
// kernel: tpu_custom_call.1
= control target key start
LH: loop header
LB: loop body
LE: loop exit
PB: predicated region body
PF: predicated region fallthrough
CT: control target
= control target key end

     0   :  { %s3681_s0 = inlined_call_operand.hbm [shape: f32[16,128], index: 0, kind: input, shape index: {}]   ;;  %s3682_s1 = inlined_call_operand.hbm [shape: f32[16,128], index: 1, kind: input, shape index: {}]   ;;  %s3683_s2 = inlined_call_operand.hbm [shape: f32[16,16,128], index: 2, kind: input, shape index: {}]   ;;  %s3684_s3 = inlined_call_operand.hbm [shape: f32[16,16,128], index: 3, kind: input, shape index: {}]   ;;  %s3685_s4 = inlined_call_operand.hbm [shape: f32[128,128], index: 4, kind: input, shape index: {}]   ;;  %s3686_s5 = inlined_call_operand.vmem [shape: f32[1,128], index: 5, kind: input, shape index: {}]   ;;  %s3687_s6 = inlined_call_operand.hbm [shape: f32[128,128], index: 6, kind: input, shape index: {}]   ;;  %s3688_s7 = inlined_call_operand.vmem [shape: f32[1,128], index: 7, kind: input, shape index: {}]   ;;  %s3689_s8 = inlined_call_operand.hbm [shape: f32[128,128], index: 8, kind: input, shape index: {}]   ;;  %s3690_s9 = inlined_call_operand.vmem [shape: f32[1,128], index: 9, kind: input, shape index: {}]   ;;  %s3691_s10 = inlined_call_operand.hbm [shape: f32[128,128], index: 10, kind: input, shape index: {}]   ;;  %s3692_s11 = inlined_call_operand.vmem [shape: f32[1,128], index: 11, kind: input, shape index: {}]   ;;  %s3693_s12 = inlined_call_operand.vmem [shape: f32[1,128], index: 12, kind: input, shape index: {}]   ;;  %s3694_s13 = inlined_call_operand.hbm [shape: f32[128,128], index: 13, kind: input, shape index: {}]   ;;  %s3695_s14 = inlined_call_operand.vmem [shape: f32[1,128], index: 14, kind: input, shape index: {}]   ;;  %s3696_s15 = inlined_call_operand.hbm [shape: f32[16,128], index: 15, kind: output, shape index: {}]  }
   0x1   :  { %3729 = sst [smem:[#allocation42_spill]] %s3681_s0 }
   0x2   :  { %3730 = sst [smem:[#allocation43_spill]] %s3682_s1 }
   0x3   :  { %3731 = sst [smem:[#allocation44_spill]] %s3683_s2 }
   0x4   :  { %3732 = sst [smem:[#allocation45_spill]] %s3684_s3 }
   0x5   :  { %3733 = sst [smem:[#allocation46_spill]] %s3685_s4 }
   0x6   :  { %3734 = sst [smem:[#allocation47_spill]] %s3686_s5 }
   0x7   :  { %3735 = sst [smem:[#allocation48_spill]] %s3687_s6 }
   0x8   :  { %3736 = sst [smem:[#allocation49_spill]] %s3688_s7 }
   0x9   :  { %3737 = sst [smem:[#allocation50_spill]] %s3690_s9 }
   0xa   :  { %3738 = sst [smem:[#allocation51_spill]] %s3691_s10 }
   0xb   :  { %3739 = sst [smem:[#allocation52_spill]] %s3692_s11 }
   0xc   :  { %3740 = sst [smem:[#allocation53_spill]] %s3693_s12 }
   0xd   :  { %3741 = sst [smem:[#allocation54_spill]] %s3694_s13 }
   0xe   :  { %3742 = sst [smem:[#allocation55_spill]] %s3695_s14 }
   0xf   :  { %3743 = sst [smem:[#allocation56_spill]] %s3696_s15 }
  0x10   :  { %20 = vsyncpa [#allocation9], 0 }
  0x11   :  { %22 = vsyncpa [#allocation9 + $0x1], 0 }
  0x12   :  { %23 = vsyncpa [#allocation12], 0 }
  0x13   :  { %25 = vsyncpa [#allocation12 + $0x1], 0 }
  0x14   :  { %26 = vsyncpa [#allocation15], 0 }
  0x15   :  { %28 = vsyncpa [#allocation15 + $0x1], 0 }
  0x16   :  { %29 = vsyncpa [#allocation18], 0 }
  0x17   :  { %30 = vsyncpa [#allocation21], 0 }
  0x18   :  { %31 = vsyncpa [#allocation10], 0 }
  0x19   :  { %33 = vsyncpa [#allocation10 + $0x1], 0  ;;  %s2970_s18 = smov 0   ;;  %s2972_s19 = smov 0  }
  0x1a   :  { %s2974_s20 = smov 0   ;;  %s2976_s21 = smov 0  }
  0x1b   :  { %s2978_s22 = smov 0   ;;  %s2980_s23 = smov 0  }
  0x1c   :  { %s2982_s24 = smov 0   ;;  %s2984_s25 = smov 0  }
  0x1d   :  { %s2986_s26 = smov 0   ;;  %s2988_s27 = smov 0  }
  0x1e   :  { %s2990_s28 = smov 0  }
  0x1f LB: > { %3744 = sst [smem:[#allocation32_spill]] %s2837_s21  ;;  %s3026_s29 = sadd.s32 4294967295, %s2865_s28   ;;  %s2865_s28 = sphi %s2990_s28, %s39_s28   ;;  %s2861_s27 = sphi %s2988_s27, %s3825_s27   ;;  %s2857_s26 = sphi %s2986_s26, %s3824_s26   ;;  %s2853_s25 = sphi %s2984_s25, %s3823_s25   ;;  %s2849_s24 = sphi %s2982_s24, %s3822_s24   ;;  %s2845_s23 = sphi %s2980_s23, %s3821_s23   ;;  %s2841_s22 = sphi %s2978_s22, %s3820_s22   ;;  %s2837_s21 = sphi %s2976_s21, %s3819_s21   ;;  %s2833_s20 = sphi %s2974_s20, %s3818_s20   ;;  %s2829_s19 = sphi %s2972_s19, %s3817_s19   ;;  %s2825_s18 = sphi %s2970_s18, %s3816_s18  }
  0x20   : > { %3745 = sst [smem:[#allocation33_spill]] %s2849_s24  ;;  %p1820_p0 = scmp.ge.s32.totalorder %s2865_s28, 1 }
  0x21   : > { %3746 = sst [smem:[#allocation34_spill]] %s2853_s25  ;;  %p3704_p1 = scmp.eq.s32.totalorder %s3026_s29, 0 }
  0x22   : > { %p421_p2 = scmp.lt.s32.totalorder %s2865_s28, 5  ;;  %s2867_s16 = smov [#allocation16]  }
  0x23   : > { %s433_s17 = sshll.u32 %s2867_s16, 4  ;;  %s2868_s25 = smov [#allocation17]   ;;  %s3035_s17 = int_to_ptr.vmem [resolvable:$true] %s433_s17 }
  0x24   : > { %p3031_p3 = pnand %p1820_p0, %p421_p2  ;;  %s449_s14 = sshll.u32 %s2868_s25, 4  ;;  %s3045_s14 = int_to_ptr.vmem [resolvable:$true] %s449_s14 }
  0x25   : > { %s2869_s12 = smov [#allocation20]   ;;  %s3750_s4 = sld [smem:[#allocation46_spill]] }
  0x26   : > { %s3747_s30 = scalar_select %p3031_p3, 1, 0 }
  0x27   : > { %p2276_p4 = pneg %p3031_p3  ;;  %s3047_s11 = sshll.u32 %s2869_s12, 4  ;;  %s482_s11 = int_to_ptr.vmem [resolvable:$true] %s3047_s11 }
  0x28   : > { %3748 = sst [smem:[#allocation35_spill]] %s3747_s30 }
  0x29   : > { %p3041_p5 = pnand %p2276_p4, %p3704_p1 }
  0x2b   : > { %s3749_s15 = scalar_select %p3041_p5, 1, 0 }
  0x2c   : > { %s2459_s16 = scalar_lea.hbm %s3750_s4, 2048  ;;  %p3057_p7 = pneg %p3041_p5 }
  0x2d   : > { %p2460_p6 = scmp.ne.s32.totalorder %s3750_s4, %s2459_s16  ;;  %p2466_p10 = scmp.lt.u32.totalorder %s2459_s16, %s3750_s4 }
  0x2f   : > { %p2462_p8 = pnand %p3057_p7, %p2460_p6 }
  0x31   : > { %p2463_p9 = pneg %p2462_p8 }
  0x33   : > { %p2468_p11 = pnand %p2466_p10, %p2463_p9 }
  0x35   : > { %2471 = shalt.err (!%p2468_p11)
}
  0x36   : > { %s2472_s5 = scalar_lea.vmem %s3035_s17, 2048  ;;  %p2480_p2 = scmp.lt.s32.totalorder %s3035_s17, %s3035_s17 }
  0x37   : > { %p2473_p12 = scmp.ne.s32.totalorder %s3035_s17, %s2472_s5  ;;  %p2481_p4 = scmp.lt.s32.totalorder %s2472_s5, %s2472_s5 }
  0x39   : > { %p2475_p13 = pnand %p2473_p12, %p3057_p7  ;;  %p2482_p6 = por %p2481_p4, %p2480_p2 }
  0x3b   : > { %p2476_p0 = pneg %p2475_p13 }
  0x3d   : > { %p2483_p8 = pnand %p2482_p6, %p2476_p0 }
  0x3f   : > { %2486 = shalt.err (!%p2483_p8)
}
  0x40   : > { %s3706_s7 = smov 128   ;;  %s3712_s9 = smov 8  }
  0x41   : > { %2279 = dma.hbm_to_vmem [thread:$0]  (!%p3041_p5), %s3750_s4, 2048, %s3035_s17, [#allocation15], %s3706_s7, %s3706_s7, %s3712_s9  }
  0x42   : > { %s3752_s6 = sld [smem:[#allocation48_spill]] }
  0x48   : > { %s2487_s5 = scalar_lea.hbm %s3752_s6, 2048 }
  0x49   : > { %p2488_p9 = scmp.ne.s32.totalorder %s3752_s6, %s2487_s5  ;;  %p2494_p12 = scmp.lt.u32.totalorder %s2487_s5, %s3752_s6 }
  0x4b   : > { %p2490_p10 = pnand %p2488_p9, %p3057_p7 }
  0x4d   : > { %p2491_p11 = pneg %p2490_p10 }
  0x4f   : > { %p2496_p13 = pnand %p2494_p12, %p2491_p11 }
  0x51   : > { %2499 = shalt.err (!%p2496_p13)
}
  0x52   : > { %s2500_s17 = scalar_lea.vmem %s3045_s14, 2048  ;;  %p2508_p6 = scmp.lt.s32.totalorder %s3045_s14, %s3045_s14 }
  0x53   : > { %p2501_p0 = scmp.ne.s32.totalorder %s3045_s14, %s2500_s17  ;;  %p2509_p8 = scmp.lt.s32.totalorder %s2500_s17, %s2500_s17 }
  0x55   : > { %p2503_p2 = pnand %p2501_p0, %p3057_p7  ;;  %p2510_p9 = por %p2509_p8, %p2508_p6 }
  0x57   : > { %p2504_p4 = pneg %p2503_p2 }
  0x59   : > { %p2511_p10 = pnand %p2510_p9, %p2504_p4 }
  0x5b   : > { %2514 = shalt.err (!%p2511_p10)
}
  0x5c   : > { %2282 = dma.hbm_to_vmem [thread:$0]  (!%p3041_p5), %s3752_s6, 2048, %s3045_s14, [#allocation18], %s3706_s7, %s3706_s7, %s3712_s9  }
  0x5d   : > { %s3753_s10 = sld [smem:[#allocation51_spill]] }
  0x63   : > { %s2515_s24 = scalar_lea.hbm %s3753_s10, 2048 }
  0x64   : > { %p2516_p11 = scmp.ne.s32.totalorder %s3753_s10, %s2515_s24  ;;  %p2522_p0 = scmp.lt.u32.totalorder %s2515_s24, %s3753_s10 }
  0x66   : > { %p2518_p12 = pnand %p2516_p11, %p3057_p7 }
  0x68   : > { %p2519_p13 = pneg %p2518_p12 }
  0x6a   : > { %p2524_p2 = pnand %p2522_p0, %p2519_p13 }
  0x6c   : > { %2527 = shalt.err (!%p2524_p2)
}
  0x6d   : > { %s2528_s17 = scalar_lea.vmem %s482_s11, 2048  ;;  %p2536_p9 = scmp.lt.s32.totalorder %s482_s11, %s482_s11 }
  0x6e   : > { %p2529_p4 = scmp.ne.s32.totalorder %s482_s11, %s2528_s17  ;;  %p2537_p10 = scmp.lt.s32.totalorder %s2528_s17, %s2528_s17 }
  0x70   : > { %p2531_p6 = pnand %p2529_p4, %p3057_p7  ;;  %p2538_p1 = por %p2537_p10, %p2536_p9 }
  0x72   : > { %p2532_p8 = pneg %p2531_p6 }
  0x74   : > { %p2539_p3 = pnand %p2538_p1, %p2532_p8 }
  0x76   : > { %2542 = shalt.err (!%p2539_p3)
}
  0x77   : > { %2288 = dma.hbm_to_vmem [thread:$0]  (!%p3041_p5), %s3753_s10, 2048, %s482_s11, [#allocation21], %s3706_s7, %s3706_s7, %s3712_s9  }
  0x78   : > { %s1819_s2 = sadd.s32 4294967294, %s2865_s28   ;;  %s48_s3 = sadd.s32 1, %s2857_s26 }
  0x79   : > { %s51_s13 = sadd.s32 1, %s2861_s27  ;;  %p49_p1 = scmp.ge.s32.totalorder %s48_s3, 2 }
  0x7a   : > { %s58_s24 = sadd.s32 1, %s2845_s23  ;;  %p65_p3 = scmp.ne.s32.totalorder %s2845_s23, %s2841_s22 }
  0x7b   : > { %p66_p11 = scmp.eq.s32.totalorder %s2865_s28, 0  ;;  %s3827_s3 = smov (%p49_p1, %s48_s3), 0 }
  0x7c   : > { %3754 = sst [smem:[#allocation36_spill]] %s3827_s3  ;;  %s3829_s13 = smov (!%p49_p1, %s51_s13), %s2861_s27 }
  0x7d   : > { %p3144_p12 = por %p66_p11, %p65_p3  ;;  %p3708_p13 = scmp.ne.s32.totalorder %s2841_s22, %s2837_s21 }
  0x7e   : > { %p53_p0 = scmp.ge.s32.totalorder %s3829_s13, 2  ;;  %s108_s16 = ssub.s32 %s2857_s26, %s3827_s3 }
  0x7f   : > { %p3756_p2 = scmp.eq.s32.totalorder %s3026_s29, 0  ;;  %s112_s12 = sadd.s32 1, %s2833_s20 }
  0x80   : > { %s3831_s13 = smov (%p53_p0, %s3829_s13), 0  ;;  %p119_p6 = scmp.ne.s32.totalorder %s2833_s20, %s2829_s19 }
  0x81   : > { %p3157_p4 = por %p3756_p2, %p3708_p13  ;;  %3758 = sst [smem:[#allocation37_spill]] %s3831_s13 }
  0x82   : > { %p125_p8 = scmp.ne.s32.totalorder %s2829_s19, %s2825_s18  ;;  %s55_s5 = ssub.s32 %s2861_s27, %s3831_s13 }
  0x83   : > { %s3757_s25 = scalar_select %p3157_p4, 1, 0 }
  0x84   : > { %p408_p9 = scmp.eq.s32.totalorder %s3026_s29, 3  ;;  %p56_p10 = scmp.eq.s32.totalorder %s55_s5, 0 }
  0x85   : > { %s109_s17 = sor.u32 %s108_s16, %s55_s5  ;;  %p3173_p2 = por %p119_p6, %p66_p11 }
  0x86   : > { %p110_p1 = scmp.eq.s32.totalorder %s109_s17, 0  ;;  %p3762_p0 = scmp.eq.s32.totalorder %s3026_s29, 0 }
  0x87   : > { %s3178_s0 = scalar_select %p56_p10, %s2845_s23, %s58_s24  }
  0x88   : > { %s3181_s7 = scalar_select %p110_p1, %s2833_s20, %s112_s12  }
  0x89   : > { %3760 = sst [smem:[#allocation38_spill]] %s3178_s0  ;;  %p3185_p13 = por %p125_p8, %p3762_p0 }
  0x8a   : > { %3761 = sst [smem:[#allocation39_spill]] %s3181_s7  ;;  %p3192_p4 = por %p408_p9, %p65_p3 }
  0x8b   : > { %s3763_s18 = scalar_select %p3185_p13, 1, 0 }
  0x8c   : > { %s3764_s16 = scalar_select %p3192_p4, 1, 0 }
  0x8d   : > { %p414_p11 = scmp.eq.s32.totalorder %s1819_s2, 3  ;;  %p2314_p6 = scmp.lt.s32.totalorder %s2865_s28, 4 }
  0x8e   : > { %3765 = sst [smem:[#allocation40_spill]] %s3764_s16  ;;  %s3714_s5 = sand.u32 1, %s2845_s23  }
  0x8f   : > { %s3717_s17 = sshll.u32 %s2861_s27, 7  ;;  %p3766_p10 = scmp.ne.s32.totalorder %s2841_s22, %s2837_s21 }
  0x90   : > { %s3208_s12 = sshll.u32 %s3714_s5, 3  ;;  %p3212_p8 = pnand %p2314_p6, %p3144_p12 }
  0x91   : > { %p3202_p5 = por %p414_p11, %p3766_p10  ;;  %s3719_s2 = sand.u32 1, %s2865_s28  }
  0x92   : > { %s3770_s1 = sld [smem:[#allocation43_spill]]  ;;  %s539_s5 = scalar_lea.vmem [#allocation11], %s3208_s12 }
  0x93   : > { %s3767_s24 = scalar_select %p3202_p5, 1, 0 }
  0x94   : > { %s546_s11 = sshll.u32 %s539_s5, 4  ;;  %p3230_p3 = pnand %p2314_p6, %p3173_p2  ;;  %s3226_s11 = int_to_ptr.vmem [resolvable:$true] %s546_s11 }
  0x95   : > { %3768 = sst [smem:[#allocation41_spill]] %s3767_s24  ;;  %s3236_s0 = scalar_lea.sflag [#allocation12], %s3719_s2 }
  0x96   : > { %s3771_s3 = scalar_select %p3230_p3, 1, 0 }
  0x97   : > { %p3723_p9 = pneg %p3212_p8 }
  0x98   : > { %s3222_s10 = scalar_lea.hbm %s3770_s1, %s3717_s17  ;;  %s2548_s13 = scalar_lea.hbm %s3770_s1, 256 }
  0x99   : > { %s2543_s4 = scalar_lea.hbm %s3222_s10, 128  ;;  %p2549_p2 = scmp.lt.u32.totalorder %s3222_s10, %s3770_s1 }
  0x9a   : > { %p2544_p12 = scmp.ne.s32.totalorder %s3222_s10, %s2543_s4  ;;  %p2550_p11 = scmp.lt.u32.totalorder %s2548_s13, %s2543_s4 }
  0x9b   : > { %p2552_p10 = scmp.lt.u32.totalorder %s2543_s4, %s3222_s10 }
  0x9c   : > { %p2546_p1 = pnand %p3723_p9, %p2544_p12  ;;  %p2551_p6 = por %p2550_p11, %p2549_p2 }
  0x9e   : > { %p2547_p0 = pneg %p2546_p1  ;;  %p2553_p5 = por %p2552_p10, %p2551_p6 }
  0xa0   : > { %p2554_p4 = pnand %p2553_p5, %p2547_p0 }
  0xa2   : > { %2557 = shalt.err (!%p2554_p4)
}
  0xa3   : > { %s2558_s2 = scalar_lea.vmem %s3226_s11, 128  ;;  %s2872_s6 = smov [#allocation11]  }
  0xa4   : > { %p2559_p12 = scmp.ne.s32.totalorder %s3226_s11, %s2558_s2  ;;  %s2563_s5 = sshll.u32 %s2872_s6, 4  ;;  %s2564_s5 = int_to_ptr.vmem [resolvable:$false] %s2563_s5 }
  0xa5   : > { %s2565_s17 = scalar_lea.vmem %s2564_s5, 256  ;;  %p2566_p3 = scmp.lt.s32.totalorder %s3226_s11, %s2564_s5 }
  0xa6   : > { %p2561_p1 = pnand %p2559_p12, %p3723_p9  ;;  %p2567_p2 = scmp.lt.s32.totalorder %s2565_s17, %s2558_s2 }
  0xa8   : > { %p2562_p13 = pneg %p2561_p1  ;;  %p2568_p11 = por %p2567_p2, %p2566_p3 }
  0xaa   : > { %p2569_p6 = pnand %p2568_p11, %p2562_p13 }
  0xac   : > { %2572 = shalt.err (!%p2569_p6)
}
  0xad   : > { %2298 = dma.hbm_to_vmem [thread:$0]  (!%p3212_p8), %s3222_s10, 128, %s3226_s11, %s3236_s0  }
  0xae   : > { %s2873_s13 = smov [#allocation19]   ;;  %s2874_s14 = smov [#allocation22]  }
  0xaf   : > { %s465_s4 = sshll.u32 %s2873_s13, 4  ;;  %s500_s1 = sshll.u32 %s2874_s14, 4  ;;  %s466_s4 = int_to_ptr.vmem [resolvable:$true] %s465_s4  ;;  %s3264_s1 = int_to_ptr.vmem [resolvable:$true] %s500_s1 }
  0xb0   : > { %s2573_s2 = scalar_lea.hbm %s3689_s8, 2048 }
  0xb1   : > { %p2574_p5 = scmp.ne.s32.totalorder %s3689_s8, %s2573_s2  ;;  %p2580_p3 = scmp.lt.u32.totalorder %s2573_s2, %s3689_s8 }
  0xb3   : > { %p2576_p13 = pnand %p2574_p5, %p3057_p7 }
  0xb5   : > { %p2577_p4 = pneg %p2576_p13 }
  0xb7   : > { %p2582_p0 = pnand %p2580_p3, %p2577_p4 }
  0xb9   : > { %2585 = shalt.err (!%p2582_p0)
}
  0xba   : > { %s2586_s11 = scalar_lea.vmem %s466_s4, 2048  ;;  %p2594_p2 = scmp.lt.s32.totalorder %s466_s4, %s466_s4 }
  0xbb   : > { %p2587_p10 = scmp.ne.s32.totalorder %s466_s4, %s2586_s11  ;;  %p2595_p11 = scmp.lt.s32.totalorder %s2586_s11, %s2586_s11 }
  0xbd   : > { %p2589_p12 = pnand %p2587_p10, %p3057_p7  ;;  %p2596_p6 = por %p2595_p11, %p2594_p2 }
  0xbf   : > { %p2590_p1 = pneg %p2589_p12 }
  0xc1   : > { %p2597_p9 = pnand %p2596_p6, %p2590_p1 }
  0xc3   : > { %2600 = shalt.err (!%p2597_p9)
}
  0xc4   : > { %p3772_p5 = scmp.ne.s32.totalorder %s3749_s15, 0  ;;  %s3773_s7 = smov 8  }
  0xc5   : > { %s3774_s13 = smov 128   ;;  %s3775_s2 = sld [smem:[#allocation54_spill]] }
  0xc6   : > { %2285 = dma.hbm_to_vmem [thread:$0]  (!%p3772_p5), %s3689_s8, 2048, %s466_s4, [#allocation18], %s3774_s13, %s3774_s13, %s3773_s7  }
  0xcb   : > { %s2601_s17 = scalar_lea.hbm %s3775_s2, 2048 }
  0xcc   : > { %p2602_p13 = scmp.ne.s32.totalorder %s3775_s2, %s2601_s17  ;;  %p2608_p3 = scmp.lt.u32.totalorder %s2601_s17, %s3775_s2 }
  0xce   : > { %p2604_p9 = pnand %p2602_p13, %p3057_p7 }
  0xd0   : > { %p2605_p4 = pneg %p2604_p9 }
  0xd2   : > { %p2610_p0 = pnand %p2608_p3, %p2605_p4 }
  0xd4   : > { %2613 = shalt.err (!%p2610_p0)
}
  0xd5   : > { %s2614_s4 = scalar_lea.vmem %s3264_s1, 2048  ;;  %p2622_p2 = scmp.lt.s32.totalorder %s3264_s1, %s3264_s1 }
  0xd6   : > { %p2615_p10 = scmp.ne.s32.totalorder %s3264_s1, %s2614_s4  ;;  %p2623_p11 = scmp.lt.s32.totalorder %s2614_s4, %s2614_s4 }
  0xd8   : > { %p2617_p12 = pnand %p2615_p10, %p3057_p7  ;;  %p2624_p6 = por %p2623_p11, %p2622_p2 }
  0xda   : > { %p2618_p1 = pneg %p2617_p12 }
  0xdc   : > { %p2625_p13 = pnand %p2624_p6, %p2618_p1 }
  0xde   : > { %2628 = shalt.err (!%p2625_p13)
}
  0xdf   : > { %2291 = dma.hbm_to_vmem [thread:$0]  (!%p3772_p5), %s3775_s2, 2048, %s3264_s1, [#allocation21], %s3774_s13, %s3774_s13, %s3773_s7  }
  0xe0   : > { %s3776_s30 = sshll.u32 %s2861_s27, 7  ;;  %s3777_s6 = sld [smem:[#allocation42_spill]] }
  0xe1   : > { %s521_s15 = scalar_lea.vmem [#allocation8], %s3208_s12  ;;  %s555_s10 = sand.u32 1, %s2833_s20  }
  0xe2   : > { %s528_s17 = sshll.u32 %s521_s15, 4  ;;  %s3778_s11 = sand.u32 1, %s2845_s23   ;;  %s3321_s17 = int_to_ptr.vmem [resolvable:$true] %s528_s17 }
  0xe3   : > { %s518_s4 = scalar_lea.sflag [#allocation9], %s3778_s11  ;;  %p3779_p5 = pneg %p3212_p8 }
  0xe6   : > { %s3318_s5 = scalar_lea.hbm %s3777_s6, %s3776_s30  ;;  %s2634_s30 = scalar_lea.hbm %s3777_s6, 256 }
  0xe7   : > { %s2629_s21 = scalar_lea.hbm %s3318_s5, 128  ;;  %p2635_p3 = scmp.lt.u32.totalorder %s3318_s5, %s3777_s6 }
  0xe8   : > { %p2630_p7 = scmp.ne.s32.totalorder %s3318_s5, %s2629_s21  ;;  %p2636_p0 = scmp.lt.u32.totalorder %s2634_s30, %s2629_s21 }
  0xe9   : > { %p2638_p12 = scmp.lt.u32.totalorder %s2629_s21, %s3318_s5 }
  0xea   : > { %p2632_p9 = pnand %p2630_p7, %p3779_p5  ;;  %p2637_p10 = por %p2636_p0, %p2635_p3 }
  0xec   : > { %p2633_p4 = pneg %p2632_p9  ;;  %p2639_p1 = por %p2638_p12, %p2637_p10 }
  0xee   : > { %p2640_p2 = pnand %p2639_p1, %p2633_p4 }
  0xf0   : > { %2643 = shalt.err (!%p2640_p2)
}
  0xf1   : > { %s2644_s12 = scalar_lea.vmem %s3321_s17, 128  ;;  %p3780_p6 = pmov %p3779_p5 }
  0xf2   : > { %p2645_p11 = scmp.ne.s32.totalorder %s3321_s17, %s2644_s12  ;;  %s2875_s15 = smov [#allocation8]  }
  0xf3   : > { %s2649_s11 = sshll.u32 %s2875_s15, 4  ;;  %s2650_s11 = int_to_ptr.vmem [resolvable:$false] %s2649_s11 }
  0xf4   : > { %p2647_p13 = pnand %p2645_p11, %p3780_p6  ;;  %s2651_s1 = scalar_lea.vmem %s2650_s11, 256 }
  0xf5   : > { %p2652_p5 = scmp.lt.s32.totalorder %s3321_s17, %s2650_s11  ;;  %p2653_p9 = scmp.lt.s32.totalorder %s2651_s1, %s2644_s12 }
  0xf6   : > { %p2648_p7 = pneg %p2647_p13 }
  0xf7   : > { %p2654_p3 = por %p2653_p9, %p2652_p5 }
  0xf9   : > { %p2655_p0 = pnand %p2654_p3, %p2648_p7 }
  0xfb   : > { %2658 = shalt.err (!%p2655_p0)
}
  0xfc   : > { %2295 = dma.hbm_to_vmem [thread:$0]  (!%p3212_p8), %s3318_s5, 128, %s3321_s17, %s518_s4  }
  0xfd   : > { %s3351_s21 = sshll.u32 %s555_s10, 6  ;;  %s3781_s16 = sshll.u32 %s2861_s27, 4 }
  0xfe   : > { %s3356_s30 = sadd.s32 %s2857_s26, %s3781_s16  ;;  %s3782_s12 = sld [smem:[#allocation44_spill]] }
  0xff   : > { %s1834_s24 = sshll.u32 %s3356_s30, 7  ;;  %s557_s5 = scalar_lea.vmem [#allocation13], %s3351_s21 }
 0x100   : > { %s566_s17 = sshll.u32 %s557_s5, 4  ;;  %p3783_p4 = scmp.ne.s32.totalorder %s3771_s3, 0  ;;  %s3367_s17 = int_to_ptr.vmem [resolvable:$true] %s566_s17 }
 0x102   : > { %p2661_p10 = pneg %p3783_p4 }
 0x104   : > { %s3364_s15 = scalar_lea.hbm %s3782_s12, %s1834_s24  ;;  %s2664_s1 = scalar_lea.hbm %s3782_s12, 4096 }
 0x105   : > { %s2659_s10 = scalar_lea.hbm %s3364_s15, 1024  ;;  %p2665_p2 = scmp.lt.u32.totalorder %s3364_s15, %s3782_s12 }
 0x106   : > { %p2660_p8 = scmp.ne.s32.totalorder %s3364_s15, %s2659_s10  ;;  %p2666_p11 = scmp.lt.u32.totalorder %s2664_s1, %s2659_s10 }
 0x107   : > { %p2668_p13 = scmp.lt.u32.totalorder %s2659_s10, %s3364_s15 }
 0x108   : > { %p2662_p12 = pnand %p2661_p10, %p2660_p8  ;;  %p2667_p6 = por %p2666_p11, %p2665_p2 }
 0x10a   : > { %p2663_p1 = pneg %p2662_p12  ;;  %p2669_p7 = por %p2668_p13, %p2667_p6 }
 0x10c   : > { %p2670_p5 = pnand %p2669_p7, %p2663_p1 }
 0x10e   : > { %2673 = shalt.err (!%p2670_p5)
}
 0x10f   : > { %s2674_s14 = scalar_lea.vmem %s3367_s17, 1024  ;;  %s2876_s5 = smov [#allocation13]  }
 0x110   : > { %p2675_p9 = scmp.ne.s32.totalorder %s3367_s17, %s2674_s14  ;;  %s2679_s4 = sshll.u32 %s2876_s5, 4  ;;  %s2680_s4 = int_to_ptr.vmem [resolvable:$false] %s2679_s4 }
 0x111   : > { %s2681_s11 = scalar_lea.vmem %s2680_s4, 2048  ;;  %p2682_p8 = scmp.lt.s32.totalorder %s3367_s17, %s2680_s4 }
 0x112   : > { %p2677_p3 = pnand %p2675_p9, %p2661_p10  ;;  %p2683_p12 = scmp.lt.s32.totalorder %s2681_s11, %s2674_s14 }
 0x114   : > { %p2678_p0 = pneg %p2677_p3  ;;  %p2684_p2 = por %p2683_p12, %p2682_p8 }
 0x116   : > { %p2685_p11 = pnand %p2684_p2, %p2678_p0 }
 0x118   : > { %2688 = shalt.err (!%p2685_p11)
}
 0x119   : > { %s2877_s10 = smov 256   ;;  %s3784_s9 = sld [smem:[#allocation45_spill]] }
 0x11a   : > { %2301 = dma.hbm_to_vmem [thread:$0]  (!%p3783_p4), %s3364_s15, 1024, %s3367_s17, %s3236_s0, %s2877_s10, %s3774_s13, %s3773_s7  }
 0x11b   : > { %s580_s5 = scalar_lea.vmem [#allocation14], %s3351_s21  ;;  %s3785_s11 = sand.u32 1, %s2865_s28  }
 0x11c   : > { %s589_s4 = sshll.u32 %s580_s5, 4  ;;  %s3410_s2 = scalar_lea.sflag [#allocation15], %s3785_s11  ;;  %s3406_s4 = int_to_ptr.vmem [resolvable:$true] %s589_s4 }
 0x11f   : > { %s3403_s14 = scalar_lea.hbm %s3784_s9, %s1834_s24  ;;  %s2694_s24 = scalar_lea.hbm %s3784_s9, 4096 }
 0x120   : > { %s2689_s6 = scalar_lea.hbm %s3403_s14, 1024  ;;  %p2695_p7 = scmp.lt.u32.totalorder %s3403_s14, %s3784_s9 }
 0x121   : > { %p2690_p1 = scmp.ne.s32.totalorder %s3403_s14, %s2689_s6  ;;  %p2696_p5 = scmp.lt.u32.totalorder %s2694_s24, %s2689_s6 }
 0x122   : > { %p2698_p3 = scmp.lt.u32.totalorder %s2689_s6, %s3403_s14 }
 0x123   : > { %p2692_p6 = pnand %p2690_p1, %p2661_p10  ;;  %p2697_p9 = por %p2696_p5, %p2695_p7 }
 0x125   : > { %p2693_p13 = pneg %p2692_p6  ;;  %p2699_p0 = por %p2698_p3, %p2697_p9 }
 0x127   : > { %p2700_p8 = pnand %p2699_p0, %p2693_p13 }
 0x129   : > { %2703 = shalt.err (!%p2700_p8)
}
 0x12a   : > { %s2704_s21 = scalar_lea.vmem %s3406_s4, 1024  ;;  %s2878_s1 = smov [#allocation14]  }
 0x12b   : > { %p2705_p12 = scmp.ne.s32.totalorder %s3406_s4, %s2704_s21  ;;  %s2709_s16 = sshll.u32 %s2878_s1, 4  ;;  %s2710_s16 = int_to_ptr.vmem [resolvable:$false] %s2709_s16 }
 0x12c   : > { %s2711_s5 = scalar_lea.vmem %s2710_s16, 2048  ;;  %p2712_p1 = scmp.lt.s32.totalorder %s3406_s4, %s2710_s16 }
 0x12d   : > { %p2707_p2 = pnand %p2705_p12, %p2661_p10  ;;  %p2713_p6 = scmp.lt.s32.totalorder %s2711_s5, %s2704_s21 }
 0x12f   : > { %p2708_p11 = pneg %p2707_p2  ;;  %p2714_p7 = por %p2713_p6, %p2712_p1 }
 0x131   : > { %p2715_p5 = pnand %p2714_p7, %p2708_p11 }
 0x133   : > { %2718 = shalt.err (!%p2715_p5)
}
 0x134   : > { %2304 = dma.hbm_to_vmem [thread:$0]  (!%p3783_p4), %s3403_s14, 1024, %s3406_s4, %s3410_s2, %s2877_s10, %s3774_s13, %s3773_s7  }
 0x135   : > { %s3786_s6 = sld [smem:[#allocation35_spill]] }
 0x13b   : > { %p3787_p10 = scmp.ne.s32.totalorder %s3786_s6, 0 }
 0x13c   : > { %s3442_s11 = sand.u32 (!%p3787_p10), 1, %s2841_s22   ;;  %p3788_p13 = scmp.ne.s32.totalorder (!%p3787_p10), %s3757_s25, 0 }
 0x13d   : > { %601 = sbr.rel (%p3787_p10) target bundleno = 2047 (0x7ff), region = 80  ;;  %s3445_s0 = sshll.u32 (!%p3787_p10), %s3442_s11, 3 }
 0x13e   : > { %s604_s3 = scalar_lea.sflag (!%p3787_p10), [#allocation9], %s3442_s11  ;;  %s607_s30 = scalar_lea.vmem (!%p3787_p10), [#allocation8], %s3445_s0 }
 0x144   : > { %2792 = dma.done.wait (%p3788_p13), %s604_s3, 128  }
 0x145   : > { %2794 = vsyncadd (%p3788_p13), %s604_s3, 4294967168  ;;  %s612_s7 = sand.u32 1, %s3026_s29   ;;  %s616_s2 = scalar_lea.vmem [#allocation11], %s3445_s0 }
 0x146   : > { %s613_s13 = scalar_lea.sflag [#allocation12], %s612_s7 }
 0x147   : > { %2796 = dma.done.wait (%p3788_p13), %s613_s13, 128  }
 0x148   : > { %2798 = vsyncadd (%p3788_p13), %s613_s13, 4294967168  ;;  %s623_s10 = sand.u32 1, %s2829_s19   ;;  %p3789_p4 = scmp.ne.s32.totalorder %s3763_s18, 0 }
 0x149   : > { %s1842_s14 = sshll.u32 %s623_s10, 6 }
 0x14a   : > { %s3460_s4 = scalar_lea.vmem [#allocation13], %s1842_s14 }
 0x14b   : > { %2800 = dma.done.wait (%p3789_p4), %s613_s13, 1024  }
 0x14c   : > { %2802 = vsyncadd (%p3789_p4), %s613_s13, 4294966272  ;;  %s631_s24 = scalar_lea.sflag [#allocation15], %s612_s7  ;;  %s3466_s15 = scalar_lea.vmem [#allocation14], %s1842_s14 }
 0x14d   : > { %2804 = dma.done.wait (%p3789_p4), %s631_s24, 1024  }
 0x14e   : > { %2806 = vsyncadd (%p3789_p4), %s631_s24, 4294966272  ;;  %p3790_p9 = scmp.eq.s32.totalorder %s3026_s29, 0 }
 0x150   : > { %2808 = dma.done.wait (%p3790_p9), [#allocation15], 2048   ;;  %p3791_p3 = pmov %p3790_p9 }
 0x152   : > { %2810 = vsyncadd (%p3791_p3), [#allocation15], 4294965248  ;;  %p3792_p0 = pmov %p3791_p3 }
 0x154   : > { %2812 = dma.done.wait (%p3792_p0), [#allocation18], 4096   ;;  %p3793_p8 = pmov %p3792_p0 }
 0x155   : > { %p3794_p12 = pmov %p3792_p0 }
 0x156   : > { %2814 = vsyncadd (%p3793_p8), [#allocation18], 4294963200 }
 0x157   : > { %2816 = dma.done.wait (%p3794_p12), [#allocation21], 4096   ;;  %p3795_p2 = pmov %p3792_p0 }
 0x158   : > { %s715_s25 = scalar_lea.vmem [#allocation23], %s3445_s0  ;;  %s3796_s18 = sld [smem:[#allocation33_spill]] }
 0x159   : > { %2818 = vsyncadd (%p3795_p2), [#allocation21], 4294963200 }
 0x15e   : > { %p1850_p11 = scmp.ne.s32.totalorder %s3796_s18, 0 }
 0x15f   : > { %v818_v0 = vld [vmem:[#allocation17] sm:$0xff] (!%p1850_p11)  ;;  %v819_v1 = vld [vmem:[#allocation17 + $0x8] sm:$0xff] (!%p1850_p11)  ;;  %v820_v2 = vld [vmem:[#allocation17 + $0x10] sm:$0xff] (!%p1850_p11)  ;;  %v2879_v3 = vmov (!%p1850_p11), 0.0|0.0   ;;  %vm2880_vm0 = vmmov (!%p1850_p11), 0   ;;  %v2881_v10 = vmov (!%p1850_p11), 0.0  }
 0x160   : > { %721 = sbr.rel (%p1850_p11) target bundleno = 982 (0x3d6), region = 120  ;;  %2150 = vmatprep.subr.bf16.mxu1 (!%p1850_p11), %v2879_v3  ;;  %v2151_v4 = vpack.c.bf16 (!%p1850_p11), %v819_v1, %v818_v0  ;;  %v821_v5 = vld [vmem:[#allocation17 + $0x18] sm:$0xff] (!%p1850_p11)  ;;  %2126 = vmatprep.subr.bf16.mxu0 (!%p1850_p11), %v2879_v3  ;;  %v723_v6 = vld [vmem:[#allocation16] sm:$0xff] (!%p1850_p11)  ;;  %v724_v7 = vld [vmem:[#allocation16 + $0x8] sm:$0xff] (!%p1850_p11)  ;;  %s3797_s21 = sld [smem:[#allocation49_spill]] (!%p1850_p11)  ;;  %vm1113_vm1 = vcmask (!%p1850_p11), 7168  }
 0x161   : > { %v2127_v8 = vpack.c.bf16 (!%p1850_p11), %v724_v7, %v723_v6  ;;  %v725_v9 = vld [vmem:[#allocation16 + $0x10] sm:$0xff] (!%p1850_p11)  ;;  %2018 = vmatprep.mubr.msk.f32.mxu1 (!%p1850_p11), %vm2880_vm0, %v2881_v10  ;;  %1983 = vmatprep.mubr.msk.f32.mxu0 (!%p1850_p11), %vm2880_vm0, %v2881_v10  ;;  %v2154_v11 = vpack.c.bf16 (!%p1850_p11), %v821_v5, %v820_v2  ;;  %v726_v12 = vld [vmem:[#allocation16 + $0x18] sm:$0xff] (!%p1850_p11)  ;;  %v822_v13 = vld [vmem:[#allocation17 + $0x20] sm:$0xff] (!%p1850_p11)  ;;  %s3798_s5 = sld [smem:[#allocation47_spill]] (!%p1850_p11)  ;;  %s3801_s24 = sld [smem:[#allocation53_spill]] (!%p1850_p11) }
 0x162   : > { %2152 = vmatpush3.bf16.msra.mxu1 (!%p1850_p11), %v2151_v4  ;;  %v823_v14 = vld [vmem:[#allocation17 + $0x28] sm:$0xff] (!%p1850_p11)  ;;  %v2130_v15 = vpack.c.bf16 (!%p1850_p11), %v726_v12, %v725_v9  ;;  %v727_v16 = vld [vmem:[#allocation16 + $0x20] sm:$0xff] (!%p1850_p11)  ;;  %v824_v19 = vld [vmem:[#allocation17 + $0x30] sm:$0xff] (!%p1850_p11) }
 0x163   : > { %2153 = vmatprep.subr.bf16.mxu1 (!%p1850_p11), %v2879_v3  ;;  %2128 = vmatpush3.bf16.msra.mxu0 (!%p1850_p11), %v2127_v8  ;;  %v728_v17 = vld [vmem:[#allocation16 + $0x28] sm:$0xff] (!%p1850_p11)  ;;  %v2157_v18 = vpack.c.bf16 (!%p1850_p11), %v823_v14, %v822_v13  ;;  %v825_v20 = vld [vmem:[#allocation17 + $0x38] sm:$0xff] (!%p1850_p11)  ;;  %v729_v22 = vld [vmem:[#allocation16 + $0x30] sm:$0xff] (!%p1850_p11) }
 0x164   : > { %2129 = vmatprep.subr.bf16.mxu0 (!%p1850_p11), %v2879_v3  ;;  %v2133_v21 = vpack.c.bf16 (!%p1850_p11), %v728_v17, %v727_v16  ;;  %v730_v23 = vld [vmem:[#allocation16 + $0x38] sm:$0xff] (!%p1850_p11)  ;;  %v2160_v24 = vpack.c.bf16 (!%p1850_p11), %v825_v20, %v824_v19  ;;  %v826_v25 = vld [vmem:[#allocation17 + $0x40] sm:$0xff] (!%p1850_p11)  ;;  %v827_v26 = vld [vmem:[#allocation17 + $0x48] sm:$0xff] (!%p1850_p11) }
 0x165   : > { %v2136_v27 = vpack.c.bf16 (!%p1850_p11), %v730_v23, %v729_v22  ;;  %v731_v28 = vld [vmem:[#allocation16 + $0x40] sm:$0xff] (!%p1850_p11)  ;;  %v732_v29 = vld [vmem:[#allocation16 + $0x48] sm:$0xff] (!%p1850_p11)  ;;  %v2163_v30 = vpack.c.bf16 (!%p1850_p11), %v827_v26, %v826_v25  ;;  %v828_v31 = vld [vmem:[#allocation17 + $0x50] sm:$0xff] (!%p1850_p11) }
 0x166   : > { %2155 = vmatpush3.bf16.msra.mxu1 (!%p1850_p11), %v2154_v11  ;;  %v829_v32 = vld [vmem:[#allocation17 + $0x58] sm:$0xff] (!%p1850_p11)  ;;  %v2139_v33 = vpack.c.bf16 (!%p1850_p11), %v732_v29, %v731_v28  ;;  %v733_v34 = vld [vmem:[#allocation16 + $0x50] sm:$0xff] (!%p1850_p11)  ;;  %v830_v37 = vld [vmem:[#allocation17 + $0x60] sm:$0xff] (!%p1850_p11) }
 0x167   : > { %2156 = vmatprep.subr.bf16.mxu1 %v2879_v3  ;;  %2131 = vmatpush3.bf16.msra.mxu0 %v2130_v15  ;;  %v734_v35 = vld [vmem:[#allocation16 + $0x58] sm:$0xff]  ;;  %v2166_v36 = vpack.c.bf16 %v829_v32, %v828_v31  ;;  %v831_v38 = vld [vmem:[#allocation17 + $0x68] sm:$0xff]  ;;  %v735_v40 = vld [vmem:[#allocation16 + $0x60] sm:$0xff] }
 0x168   : > { %2132 = vmatprep.subr.bf16.mxu0 %v2879_v3  ;;  %v2142_v39 = vpack.c.bf16 %v734_v35, %v733_v34  ;;  %v736_v41 = vld [vmem:[#allocation16 + $0x68] sm:$0xff]  ;;  %v2169_v42 = vpack.c.bf16 %v831_v38, %v830_v37  ;;  %v832_v43 = vld [vmem:[#allocation17 + $0x70] sm:$0xff]  ;;  %v833_v44 = vld [vmem:[#allocation17 + $0x78] sm:$0xff] }
 0x169   : > { %v2145_v45 = vpack.c.bf16 %v736_v41, %v735_v40  ;;  %v737_v46 = vld [vmem:[#allocation16 + $0x70] sm:$0xff]  ;;  %v738_v47 = vld [vmem:[#allocation16 + $0x78] sm:$0xff]  ;;  %v2172_v48 = vpack.c.bf16 %v833_v44, %v832_v43  ;;  %v1005_v50 = vld [vmem:[#allocation20] sm:$0xff] }
 0x16a   : > { %2158 = vmatpush3.bf16.msra.mxu1 %v2157_v18  ;;  %v2148_v49 = vpack.c.bf16 %v738_v47, %v737_v46  ;;  %v1006_v51 = vld [vmem:[#allocation20 + $0x8] sm:$0xff]  ;;  %v912_v52 = vld [vmem:[#allocation19] sm:$0xff]  ;;  %v817_v54 = vld [vmem:[%s616_s2] sm:$0xff]  ;;  %s3800_s2 = sld [smem:[#allocation52_spill]] }
 0x16b   : > { %2159 = vmatprep.subr.bf16.mxu1 %v2879_v3  ;;  %2134 = vmatpush3.bf16.msra.mxu0 %v2133_v21  ;;  %v913_v53 = vld [vmem:[#allocation19 + $0x8] sm:$0xff]  ;;  %v2199_v55 = vpack.c.bf16 %v1006_v51, %v1005_v50  ;;  %v1007_v58 = vld [vmem:[#allocation20 + $0x10] sm:$0xff]  ;;  %v1008_v59 = vld [vmem:[#allocation20 + $0x18] sm:$0xff] }
 0x16c   : > { %2135 = vmatprep.subr.bf16.mxu0 %v2879_v3  ;;  %v722_v56 = vld [vmem:[%s607_s30] sm:$0xff]  ;;  %v2175_v57 = vpack.c.bf16 %v913_v53, %v912_v52  ;;  %v914_v60 = vld [vmem:[#allocation19 + $0x10] sm:$0xff]  ;;  %v915_v61 = vld [vmem:[#allocation19 + $0x18] sm:$0xff]  ;;  %v2202_v62 = vpack.c.bf16 %v1008_v59, %v1007_v58  ;;  %s3799_s30 = sld [smem:[#allocation50_spill]]  ;;  %v2882_v58 = vmov 1.0  }
 0x16d   : > { %v2178_v63 = vpack.c.bf16 %v915_v61, %v914_v60  ;;  %v1009_v0 = vld [vmem:[#allocation20 + $0x20] sm:$0xff]  ;;  %v1010_v1 = vld [vmem:[#allocation20 + $0x28] sm:$0xff]  ;;  %v1011_v7 = vld [vmem:[#allocation20 + $0x30] sm:$0xff]  ;;  %1115 = vst.msk [vmem:[#allocation6] sm:$0xff] %vm1113_vm1, %v2882_v58 }
 0x16e   : > { %2161 = vmatpush3.bf16.msra.mxu1 %v2160_v24  ;;  %v916_v2 = vld [vmem:[#allocation19 + $0x20] sm:$0xff]  ;;  %v917_v4 = vld [vmem:[#allocation19 + $0x28] sm:$0xff]  ;;  %v2205_v5 = vpack.c.bf16 %v1010_v1, %v1009_v0  ;;  %v1012_v8 = vld [vmem:[#allocation20 + $0x38] sm:$0xff] }
 0x16f   : > { %2162 = vmatprep.subr.bf16.mxu1 %v2879_v3  ;;  %2137 = vmatpush3.bf16.msra.mxu0 %v2136_v27  ;;  %v2181_v6 = vpack.c.bf16 %v917_v4, %v916_v2  ;;  %v918_v9 = vld [vmem:[#allocation19 + $0x30] sm:$0xff]  ;;  %v919_v11 = vld [vmem:[#allocation19 + $0x38] sm:$0xff]  ;;  %v2208_v12 = vpack.c.bf16 %v1012_v8, %v1011_v7  ;;  %v1013_v14 = vld [vmem:[#allocation20 + $0x40] sm:$0xff] }
 0x170   : > { %2138 = vmatprep.subr.bf16.mxu0 %v2879_v3  ;;  %v2184_v13 = vpack.c.bf16 %v919_v11, %v918_v9  ;;  %v920_v15 = vld [vmem:[#allocation19 + $0x40] sm:$0xff]  ;;  %v921_v16 = vld [vmem:[#allocation19 + $0x48] sm:$0xff]  ;;  %v922_v19 = vld [vmem:[#allocation19 + $0x50] sm:$0xff] }
 0x171   : > { %v2187_v18 = vpack.c.bf16 %v921_v16, %v920_v15  ;;  %v923_v20 = vld [vmem:[#allocation19 + $0x58] sm:$0xff]  ;;  %v1015_v22 = vld [vmem:[#allocation20 + $0x50] sm:$0xff]  ;;  %v924_v25 = vld [vmem:[#allocation19 + $0x60] sm:$0xff] }
 0x172   : > { %2164 = vmatpush3.bf16.msra.mxu1 %v2163_v30  ;;  %v2190_v21 = vpack.c.bf16 %v923_v20, %v922_v19  ;;  %v1016_v23 = vld [vmem:[#allocation20 + $0x58] sm:$0xff]  ;;  %v925_v26 = vld [vmem:[#allocation19 + $0x68] sm:$0xff]  ;;  %v1017_v28 = vld [vmem:[#allocation20 + $0x60] sm:$0xff] }
 0x173   : > { %2165 = vmatprep.subr.bf16.mxu1 %v2879_v3  ;;  %2140 = vmatpush3.bf16.msra.mxu0 %v2139_v33  ;;  %v2214_v24 = vpack.c.bf16 %v1016_v23, %v1015_v22  ;;  %v2193_v27 = vpack.c.bf16 %v925_v26, %v924_v25  ;;  %v1018_v29 = vld [vmem:[#allocation20 + $0x68] sm:$0xff]  ;;  %v926_v31 = vld [vmem:[#allocation19 + $0x70] sm:$0xff]  ;;  %v927_v32 = vld [vmem:[#allocation19 + $0x78] sm:$0xff] }
 0x174   : > { %2141 = vmatprep.subr.bf16.mxu0 %v2879_v3  ;;  %v2217_v30 = vpack.c.bf16 %v1018_v29, %v1017_v28  ;;  %v2196_v33 = vpack.c.bf16 %v927_v32, %v926_v31  ;;  %v1019_v34 = vld [vmem:[#allocation20 + $0x70] sm:$0xff]  ;;  %v1020_v35 = vld [vmem:[#allocation20 + $0x78] sm:$0xff] }
 0x175   : > { %v1852_v37 = vld [vmem:[%s3797_s21] ss:$0 sm:$0xff] }
 0x176   : > { %2167 = vmatpush3.bf16.msra.mxu1 %v2166_v36  ;;  %v2220_v36 = vpack.c.bf16 %v1020_v35, %v1019_v34  ;;  %v1851_v38 = vld [vmem:[%s3798_s5] ss:$0 sm:$0xff] }
 0x177   : > { %2168 = vmatprep.subr.bf16.mxu1 %v2879_v3  ;;  %2143 = vmatpush3.bf16.msra.mxu0 %v2142_v39 }
 0x178   : > { %2144 = vmatprep.subr.bf16.mxu0 %v2879_v3 }
 0x17a   : > { %2170 = vmatpush3.bf16.msra.mxu1 %v2169_v42 }
 0x17b   : > { %2171 = vmatprep.subr.bf16.mxu1 %v2879_v3  ;;  %2146 = vmatpush3.bf16.msra.mxu0 %v2145_v45 }
 0x17c   : > { %2147 = vmatprep.subr.bf16.mxu0 %v2879_v3 }
 0x17e   : > { %2173 = vmatpush3.bf16.msra.mxu1 %v2172_v48  ;;  %v1853_v48 = vld [vmem:[%s3799_s30] ss:$0 sm:$0xff] }
 0x17f   : > { %2149 = vmatpush3.bf16.msra.mxu0 %v2148_v49  ;;  %2198 = vmatprep.subr.bf16.mxu1 %v2879_v3  ;;  %v1854_v49 = vld [vmem:[%s3800_s2] ss:$0 sm:$0xff] }
 0x180   : > { %2174 = vmatprep.subr.bf16.mxu0 %v2879_v3 }
 0x181   : > { %2019 = vmatmul.mubr.f32.vlgmr.msra.gmra.mrb[0].mxu1 %v817_v54 }
 0x182   : > { %1984 = vmatmul.mubr.f32.vlgmr.msra.gmra.mrb[0].mxu0 %v722_v56  ;;  %2200 = vmatpush3.bf16.msra.mxu1 %v2199_v55  ;;  %v1855_v55 = vld [vmem:[%s3801_s24] ss:$0 sm:$0xff] }
 0x183   : > { %2176 = vmatpush3.bf16.msra.mxu0 %v2175_v57  ;;  %2201 = vmatprep.subr.bf16.mxu1 %v2879_v3 }
 0x184   : > { %2177 = vmatprep.subr.bf16.mxu0 %v2879_v3  ;;  %2053 = vmatprep.mubr.msk.f32.mxu0 %vm2880_vm0, %v2881_v10 }
 0x185   : > { %2088 = vmatprep.mubr.msk.f32.mxu1 %vm2880_vm0, %v2881_v10  ;;  %v1014_v10 = vld [vmem:[#allocation20 + $0x48] sm:$0xff] }
 0x186   : > { %2203 = vmatpush3.bf16.msra.mxu1 %v2202_v62  ;;  %v2211_v17 = vpack.c.bf16 %v1014_v10, %v1013_v14 }
 0x187   : > { %2179 = vmatpush3.bf16.msra.mxu0 %v2178_v63  ;;  %2204 = vmatprep.subr.bf16.mxu1 %v2879_v3 }
 0x188   : > { %2180 = vmatprep.subr.bf16.mxu0 %v2879_v3 }
 0x18a   : > { %2206 = vmatpush3.bf16.msra.mxu1 %v2205_v5 }
 0x18b   : > { %2182 = vmatpush3.bf16.msra.mxu0 %v2181_v6  ;;  %2207 = vmatprep.subr.bf16.mxu1 %v2879_v3 }
 0x18c   : > { %2183 = vmatprep.subr.bf16.mxu0 %v2879_v3 }
 0x18e   : > { %2209 = vmatpush3.bf16.msra.mxu1 %v2208_v12 }
 0x18f   : > { %2185 = vmatpush3.bf16.msra.mxu0 %v2184_v13  ;;  %2210 = vmatprep.subr.bf16.mxu1 %v2879_v3 }
 0x190   : > { %2186 = vmatprep.subr.bf16.mxu0 %v2879_v3 }
 0x192   : > { %2212 = vmatpush3.bf16.msra.mxu1 %v2211_v17 }
 0x193   : > { %2188 = vmatpush3.bf16.msra.mxu0 %v2187_v18  ;;  %2213 = vmatprep.subr.bf16.mxu1 %v2879_v3 }
 0x194   : > { %2189 = vmatprep.subr.bf16.mxu0 %v2879_v3 }
 0x196   : > { %2215 = vmatpush3.bf16.msra.mxu1 %v2214_v24 }
 0x197   : > { %2191 = vmatpush3.bf16.msra.mxu0 %v2190_v21  ;;  %2216 = vmatprep.subr.bf16.mxu1 %v2879_v3 }
 0x198   : > { %2192 = vmatprep.subr.bf16.mxu0 %v2879_v3 }
 0x19a   : > { %2218 = vmatpush3.bf16.msra.mxu1 %v2217_v30 }
 0x19b   : > { %2194 = vmatpush3.bf16.msra.mxu0 %v2193_v27  ;;  %2219 = vmatprep.subr.bf16.mxu1 %v2879_v3 }
 0x19c   : > { %2195 = vmatprep.subr.bf16.mxu0 %v2879_v3 }
 0x19e   : > { %2221 = vmatpush3.bf16.msra.mxu1 %v2220_v36 }
 0x19f   : > { %2197 = vmatpush3.bf16.msra.mxu0 %v2196_v33 }
 0x254   : > { %v907_v39 = vpop.f32.mrb[0].mxu1 }
 0x255   : > { %v908_v40 = vadd.f32 %v1852_v37, %v907_v39  ;;  %v2020_v41 = vpop.f32.mrb[1].mxu1  ;;  %v812_v42 = vpop.f32.mrb[0].mxu0 }
 0x256   : > { %v813_v43 = vadd.f32 %v1851_v38, %v812_v42  ;;  %v1985_v44 = vpop.f32.mrb[1].mxu0 }
 0x257   : > { %2427 = vtanh.f32 %v908_v40 }
 0x258   : > { %v816_v3 = vmax.f32 %v813_v43, 0.0 }
 0x25a   : > { %1116 = vst [vmem:[#allocation7] sm:$0xff] %v816_v3  ;;  %2054 = vmatmul.mubr.f32.vlgmr.msra.gmra.mrb[2].mxu0 %v816_v3 }
 0x261   : > { %v2428_v45 = vpop.eup %2427 }
 0x262   : > { %1099 = vst [vmem:[#allocation3] sm:$0xff] %v2428_v45  ;;  %2089 = vmatmul.mubr.f32.vlgmr.msra.gmra.mrb[2].mxu1 %v2428_v45 }
 0x32d   : > { %v1001_v46 = vpop.f32.mrb[2].mxu0 }
 0x32e   : > { %v2055_v47 = vpop.f32.mrb[3].mxu0  ;;  %v1002_v50 = vadd.f32 %v1853_v48, %v1001_v46 }
 0x335   : > { %v1094_v51 = vpop.f32.mrb[2].mxu1 }
 0x336   : > { %v1095_v52 = vadd.f32 %v1854_v49, %v1094_v51  ;;  %v2090_v53 = vpop.f32.mrb[3].mxu1 }
 0x338   : > { %1100 = vst [vmem:[#allocation4] sm:$0xff] %v1095_v52  ;;  %v1101_v54 = vadd.f32 %v1095_v52, %v1002_v50 }
 0x33a   : > { %2429 = vtanh.f32 %v1101_v54 }
 0x344   : > { %v2430_v56 = vpop.eup %2429 }
 0x345   : > { %v1110_v57 = vmul.f32 %v2430_v56, %v1855_v55 }
 0x347   : > { %1111 = vadd.xlane.f32.xlu0 %v1110_v57 }
 0x3d4   : > { %v1112_v59 = vpop.xlane.xlu0 %1111 }
 0x3d5   : > { %1114 = vst.msk [vmem:[#allocation5] sm:$0xff] %vm1113_vm1, %v1112_v59 }
 0x3d6 PF: > { %v1132_v60 = vlaneseq  ;;  %v2883_v61 = vmov 1966171168   ;;  %v1117_v63 = vld [vmem:[#allocation4] sm:$0xff]  ;;  %v1121_v18 = vld [vmem:[%s3466_s15 + $0x10] sm:$0xff]  ;;  %v1120_v19 = vld [vmem:[%s3466_s15 + $0x8] sm:$0xff]  ;;  %s3802_s17 = sld [smem:[#allocation53_spill]] }
 0x3d7   : > { %v1130_v62 = vunpack.c.l.s4 %v2883_v61  ;;  %v1128_v2 = vcombine.high %v1117_v63, %v1117_v63  ;;  %v1119_v13 = vld [vmem:[%s3466_s15] sm:$0xff]  ;;  %v1124_v20 = vld [vmem:[%s3466_s15 + $0x28] sm:$0xff]  ;;  %v1122_v34 = vld [vmem:[%s3466_s15 + $0x18] sm:$0xff]  ;;  %vm1309_vm2 = vcmask 1041409   ;;  %vm1311_vm3 = vcmask 1042434  }
 0x3d8   : > { %v3546_v0 = vshrl.u32 %v1132_v60, 7  ;;  %v1123_v17 = vld [vmem:[%s3466_s15 + $0x20] sm:$0xff]  ;;  %v1125_v36 = vld [vmem:[%s3466_s15 + $0x30] sm:$0xff]  ;;  %v1126_v39 = vld [vmem:[%s3466_s15 + $0x38] sm:$0xff]  ;;  %s3803_s15 = sld [smem:[#allocation33_spill]]  ;;  %v1265_v58 = vand.u32 127, %v1132_v60 }
 0x3d9   : > { %v1131_v1 = vunpack.c.0.s8 %v1130_v62  ;;  %vm1313_vm4 = vcmask 1043459   ;;  %vm1315_vm5 = vcmask 1044484   ;;  %vm1317_vm6 = vcmask 1045509  }
 0x3da   : > { %v3550_v6 = vsub.s32 0, %v3546_v0  ;;  %v1279_v62 = vsub.s32 %v1265_v58, %v3546_v0  ;;  %vm1319_vm7 = vcmask 1046534   ;;  %vm1321_vm8 = vcmask 1047559  }
 0x3db   : > { %v1134_v4 = vsub.s32 %v1131_v1, %v3546_v0  ;;  %vm1326_vm10 = vcmask 64512   ;;  %vm1348_vm11 = vcmask 7168  }
 0x3dc   : > { %v1856_v42 = vld [vmem:[%s3802_s17] ss:$0 sm:$0xff] }
 0x3dd   : > { %v1135_v5 = vrot.slane %v1117_v63, %v1134_v4  ;;  %v1142_v7 = vrot.slane %v1128_v2, %v1134_v4 }
 0x3de   : > { %s1857_s21 = sshll.u32 %s3803_s15, 3  ;;  %p1858_p1 = scmp.ne.s32.totalorder %s3803_s15, 1 }
 0x3df   : > { %v1151_v8 = vrot.slane %v1135_v5, %v1134_v4  ;;  %v1143_v9 = vcombine.high %v1135_v5, %v1135_v5  ;;  %v1144_v11 = vcombine.high %v1142_v7, %v1142_v7  ;;  %v1158_v12 = vrot.slane %v1142_v7, %v1134_v4  ;;  %s3804_s16 = sld [smem:[#allocation55_spill]] (!%p1858_p1) }
 0x3e0   : > { %v1266_v7 = vstv %s1857_s21  ;;  %vm2887_vm12 = vmmov (!%p1858_p1), 0  }
 0x3e1   : > { %v1180_v14 = vrot.slane %v1151_v8, %v3550_v6  ;;  %v1173_v10 = vcombine.high %v1151_v8, %v1151_v8  ;;  %v1165_v15 = vrot.slane %v1143_v9, %v1134_v4  ;;  %v1172_v16 = vrot.slane %v1144_v11, %v1134_v4 }
 0x3e2   : > { %v1196_v21 = vrot.slane %v1158_v12, %v3550_v6  ;;  %v1174_v22 = vcombine.high %v1158_v12, %v1158_v12  ;;  %v1267_v12 = vadd.s32 %v1266_v7, %v1265_v58  ;;  %v1416_v7 = vld [vmem:[%s3460_s4 + $0x18] sm:$0xff] }
 0x3e3   : > { %v1217_v23 = vadd.f32 %v1180_v14, %v1119_v13  ;;  %v1188_v24 = vrot.slane %v1173_v10, %v3550_v6  ;;  %v1184_v25 = vrot.slane %v1165_v15, %v3550_v6  ;;  %v1200_v26 = vrot.slane %v1172_v16, %v3550_v6 }
 0x3e4   : > { %v1221_v27 = vadd.f32 %v1196_v21, %v1123_v17  ;;  %v1175_v28 = vcombine.high %v1165_v15, %v1165_v15  ;;  %v1204_v29 = vrot.slane %v1174_v22, %v3550_v6  ;;  %v1176_v30 = vcombine.high %v1172_v16, %v1172_v16 }
 0x3e5   : > { %2434 = vtanh.f32 %v1217_v23  ;;  %v1219_v31 = vadd.f32 %v1188_v24, %v1121_v18  ;;  %v1218_v32 = vadd.f32 %v1184_v25, %v1120_v19  ;;  %v1222_v33 = vadd.f32 %v1200_v26, %v1124_v20 }
 0x3e6   : > { %2436 = vtanh.f32 %v1221_v27  ;;  %v1192_v35 = vrot.slane %v1175_v28, %v3550_v6  ;;  %v1208_v37 = vrot.slane %v1176_v30, %v3550_v6  ;;  %v1223_v40 = vadd.f32 %v1204_v29, %v1125_v36  ;;  %v1325_v27 = vld [vmem:[#allocation5] sm:$0xff] }
 0x3e7   : > { %2438 = vtanh.f32 %v1219_v31  ;;  %vm1268_vm9 = vcmp.lt.s32.totalorder %v1267_v12, 12  ;;  %v2884_v26 = vmov 0  }
 0x3e8   : > { %2440 = vtanh.f32 %v1218_v32  ;;  %v1220_v38 = vadd.f32 %v1192_v35, %v1122_v34  ;;  %v1224_v41 = vadd.f32 %v1208_v37, %v1126_v39  ;;  %2431 = vset.pattern.permute.xlu1 %v2884_v26  ;;  %2432 = vset.pattern.permute.xlu0 %v2884_v26  ;;  %v1366_v34 = vsub.s32 1, %v3546_v0 }
 0x3e9   : > { %2442 = vtanh.f32 %v1222_v33  ;;  %v1387_v39 = vsub.s32 4, %v3546_v0 }
 0x3ea   : > { %2444 = vtanh.f32 %v1220_v38  ;;  %v1373_v38 = vsub.s32 2, %v3546_v0 }
 0x3eb   : > { %2446 = vtanh.f32 %v1223_v40 }
 0x3ec   : > { %2448 = vtanh.f32 %v1224_v41 }
 0x3ef   : > { %v2435_v43 = vpop.eup %2434 }
 0x3f0   : > { %v2437_v44 = vpop.eup %2436  ;;  %v1239_v3 = vmul.f32 %v2435_v43, %v1856_v42  ;;  %v1401_v43 = vsub.s32 6, %v3546_v0 }
 0x3f1   : > { %v2439_v45 = vpop.eup %2438  ;;  %v1243_v52 = vmul.f32 %v2437_v44, %v1856_v42 }
 0x3f2   : > { %v2441_v46 = vpop.eup %2440  ;;  %1247 = vadd.xlane.f32.xlu0 %v1239_v3  ;;  %v1241_v47 = vmul.f32 %v2439_v45, %v1856_v42 }
 0x3f3   : > { %v2443_v48 = vpop.eup %2442  ;;  %v1240_v49 = vmul.f32 %v2441_v46, %v1856_v42 }
 0x3f4   : > { %1251 = vadd.xlane.f32.xlu1 %v1241_v47  ;;  %v1244_v50 = vmul.f32 %v2443_v48, %v1856_v42  ;;  %v2445_v51 = vpop.eup %2444  ;;  %v1408_v47 = vsub.s32 7, %v3546_v0 }
 0x3f5   : > { %v2447_v53 = vpop.eup %2446  ;;  %v1242_v54 = vmul.f32 %v2445_v51, %v1856_v42  ;;  %v1414_v51 = vld [vmem:[%s3460_s4 + $0x8] sm:$0xff] }
 0x3f6   : > { %1249 = vadd.xlane.f32.xlu0 %v1240_v49  ;;  %v2449_v55 = vpop.eup %2448  ;;  %v1245_v56 = vmul.f32 %v2447_v53, %v1856_v42 }
 0x3f7   : > { %v1246_v57 = vmul.f32 %v2449_v55, %v1856_v42  ;;  %v1380_v42 = vsub.s32 3, %v3546_v0 }
 0x3f8   : > { %1257 = vadd.xlane.f32.xlu1 %v1244_v50 }
 0x3fa   : > { %1255 = vadd.xlane.f32.xlu0 %v1243_v52  ;;  %v1413_v52 = vld [vmem:[%s3460_s4] sm:$0xff] }
 0x3fc   : > { %1253 = vadd.xlane.f32.xlu1 %v1242_v54 }
 0x3fe   : > { %1259 = vadd.xlane.f32.xlu0 %v1245_v56 }
 0x400   : > { %1261 = vadd.xlane.f32.xlu1 %v1246_v57  ;;  %v1415_v57 = vld [vmem:[%s3460_s4 + $0x10] sm:$0xff] }
 0x47f   : > { %v1248_v59 = vpop.xlane.xlu0 %1247 }
 0x480   : > { %v1280_v4 = vrot.slane %v1248_v59, %v1279_v62 }
 0x481   : > { %v1252_v61 = vpop.xlane.xlu1 %1251 }
 0x482   : > { %v1288_v9 = vrot.slane %v1252_v61, %v1279_v62 }
 0x483   : > { %v1250_v63 = vpop.xlane.xlu0 %1249 }
 0x484   : > { %v1284_v1 = vrot.slane %v1250_v63, %v1279_v62 }
 0x485   : > { %v1258_v2 = vpop.xlane.xlu1 %1257 }
 0x486   : > { %v1310_v8 = vsel %vm1309_vm2, %v1284_v1, %v1280_v4  ;;  %v1300_v15 = vrot.slane %v1258_v2, %v1279_v62 }
 0x487   : > { %v1256_v5 = vpop.xlane.xlu0 %1255  ;;  %v1312_v14 = vsel %vm1311_vm3, %v1288_v9, %v1310_v8  ;;  %v1419_v8 = vld [vmem:[%s3460_s4 + $0x30] sm:$0xff] }
 0x488   : > { %v1296_v13 = vrot.slane %v1256_v5, %v1279_v62 }
 0x489   : > { %v1254_v11 = vpop.xlane.xlu1 %1253 }
 0x48a   : > { %v1292_v60 = vrot.slane %v1254_v11, %v1279_v62 }
 0x48b   : > { %v1260_v10 = vpop.xlane.xlu0 %1259 }
 0x48c   : > { %v1314_v16 = vsel %vm1313_vm4, %v1292_v60, %v1312_v14  ;;  %v1304_v17 = vrot.slane %v1260_v10, %v1279_v62 }
 0x48d   : > { %v1316_v18 = vsel %vm1315_vm5, %v1296_v13, %v1314_v16  ;;  %v1262_v19 = vpop.xlane.xlu1 %1261 }
 0x48e   : > { %v1308_v20 = vrot.slane %v1262_v19, %v1279_v62  ;;  %v1318_v21 = vsel %vm1317_vm6, %v1300_v15, %v1316_v18 }
 0x48f   : > { %v1320_v22 = vsel %vm1319_vm7, %v1304_v17, %v1318_v21  ;;  %v1418_v17 = vld [vmem:[%s3460_s4 + $0x28] sm:$0xff] }
 0x490   : > { %v1322_v23 = vsel %vm1321_vm8, %v1308_v20, %v1320_v22 }
 0x491   : > { %v1324_v24 = vsel %vm1268_vm9, %v1322_v23, -1e+30 }
 0x492   : > { %v1327_v25 = vsel %vm1326_vm10, %v1324_v24, -inf }
 0x493   : > { %1328 = vmax.xlane.f32.xlu0 %v1327_v25 }
 0x520   : > { %v1329_v28 = vpop.xlane.xlu0 %1328 }
 0x521   : > { %v1330_v29 = vmax.f32 %v1325_v27, %v1329_v28 }
 0x523   : > { %v1331_v30 = vsub.f32 %v1325_v27, %v1330_v29  ;;  %1495 = vst.msk [vmem:[#allocation5] sm:$0xff] %vm1348_vm11, %v1330_v29  ;;  %1336 = vperm.xlu1 %2431, %v1330_v29   ;;  %v1420_v27 = vld [vmem:[%s3460_s4 + $0x38] sm:$0xff] }
 0x525   : > { %v1332_v44 = vmul.f32 1.442695, %v1331_v30 }
 0x5a2   : > { %v1337_v31 = vpop.permute.xlu1 %1336 }
 0x5a3   : > { %v1339_v32 = vsub.f32 %v1324_v24, %v1337_v31 }
 0x5a5   : > { %v1340_v33 = vmul.f32 1.442695, %v1339_v32 }
 0x5a7   : > { %2450 = vpow2.f32 %v1340_v33 }
 0x5a8   : > { %2452 = vpow2.f32 %v1332_v44 }
 0x5b1   : > { %v2451_v35 = vpop.eup %2450 }
 0x5b2   : > { %v1367_v36 = vrot.slane %v2451_v35, %v1366_v34  ;;  %v1360_v37 = vrot.slane %v2451_v35, %v3550_v6  ;;  %v1374_v40 = vrot.slane %v2451_v35, %v1373_v38  ;;  %v1388_v41 = vrot.slane %v2451_v35, %v1387_v39  ;;  %v3591_v49 = vpop.eup %2452 }
 0x5b3   : > { %v1381_v3 = vrot.slane %v2451_v35, %v1380_v42  ;;  %v1402_v45 = vrot.slane %v2451_v35, %v1401_v43  ;;  %v1394_v6 = vsub.s32 5, %v3546_v0  ;;  %v1409_v48 = vrot.slane %v2451_v35, %v1408_v47  ;;  %v1417_v0 = vld [vmem:[%s3460_s4 + $0x20] sm:$0xff] }
 0x5b4   : > { %1369 = vbcast.lane.b32.xlu1 %v1367_v36, 256  ;;  %1362 = vbcast.lane.b32.xlu0 %v1360_v37, 256  ;;  %v1344_v50 = vsel %vm1326_vm10, %v2451_v35, 0.0 }
 0x5b5   : > { %v1395_v46 = vrot.slane %v2451_v35, %v1394_v6 }
 0x5b8   : > { %1376 = vbcast.lane.b32.xlu1 %v1374_v40, 256  ;;  %1390 = vbcast.lane.b32.xlu0 %v1388_v41, 256 }
 0x5bc   : > { %1383 = vbcast.lane.b32.xlu1 %v1381_v3, 256  ;;  %1404 = vbcast.lane.b32.xlu0 %v1402_v45, 256 }
 0x5c0   : > { %1397 = vbcast.lane.b32.xlu1 %v1395_v46, 256 }
 0x5c4   : > { %1411 = vbcast.lane.b32.xlu1 %v1409_v48, 256 }
 0x5c8   : > { %1353 = vperm.xlu1 %2431, %v3591_v49  }
 0x5db   : > { %1345 = vadd.xlane.f32.xlu0 %v1344_v50 }
 0x626   : > { %v1370_v53 = vpop.permute.xlu1 %1369  ;;  %v1363_v54 = vpop.permute.xlu0 %1362 }
 0x627   : > { %v1422_v55 = vmul.f32 %v1414_v51, %v1370_v53  ;;  %v1421_v56 = vmul.f32 %v1413_v52, %v1363_v54 }
 0x629   : > { %v1435_v58 = vrot.slane %v1422_v55, 4  ;;  %v1429_v59 = vrot.slane %v1421_v56, 4 }
 0x62a   : > { %v1377_v61 = vpop.permute.xlu1 %1376  ;;  %v1391_v62 = vpop.permute.xlu0 %1390 }
 0x62b   : > { %v1436_v63 = vadd.f32 %v1435_v58, %v1422_v55  ;;  %v1430_v1 = vadd.f32 %v1429_v59, %v1421_v56  ;;  %v1423_v2 = vmul.f32 %v1415_v57, %v1377_v61  ;;  %v1425_v4 = vmul.f32 %v1417_v0, %v1391_v62 }
 0x62d   : > { %v1441_v5 = vrot.slane %v1423_v2, 4  ;;  %v1453_v9 = vrot.slane %v1425_v4, 4  ;;  %v1437_v12 = vrot.slane %v1436_v63, 2  ;;  %v1431_v13 = vrot.slane %v1430_v1, 2 }
 0x62e   : > { %v1384_v11 = vpop.permute.xlu1 %1383  ;;  %v1405_v60 = vpop.permute.xlu0 %1404 }
 0x62f   : > { %v1442_v14 = vadd.f32 %v1441_v5, %v1423_v2  ;;  %v1424_v10 = vmul.f32 %v1416_v7, %v1384_v11  ;;  %v1427_v15 = vmul.f32 %v1419_v8, %v1405_v60  ;;  %v1454_v18 = vadd.f32 %v1453_v9, %v1425_v4  ;;  %v1342_v11 = vld [vmem:[#allocation6] sm:$0xff] }
 0x630   : > { %v1438_v22 = vadd.f32 %v1437_v12, %v1436_v63  ;;  %v1432_v23 = vadd.f32 %v1431_v13, %v1430_v1  ;;  %v1350_v63 = vld [vmem:[#allocation7] sm:$0xff]  ;;  %v1343_v60 = vmul.f32 %v3591_v49, %v1342_v11 }
 0x631   : > { %v1443_v16 = vrot.slane %v1442_v14, 2  ;;  %v1447_v19 = vrot.slane %v1424_v10, 4  ;;  %v1465_v20 = vrot.slane %v1427_v15, 4  ;;  %v1455_v28 = vrot.slane %v1454_v18, 2 }
 0x632   : > { %v1398_v21 = vpop.permute.xlu1 %1397  ;;  %v1439_v33 = vrot.slane %v1438_v22, 1  ;;  %v1433_v34 = vrot.slane %v1432_v23, 1 }
 0x633   : > { %v1444_v24 = vadd.f32 %v1443_v16, %v1442_v14  ;;  %v1448_v25 = vadd.f32 %v1447_v19, %v1424_v10  ;;  %v1426_v26 = vmul.f32 %v1418_v17, %v1398_v21  ;;  %v1466_v30 = vadd.f32 %v1465_v20, %v1427_v15  ;;  %v1511_v10 = vld [vmem:[#allocation22] sm:$0xff] (!%p1858_p1)  ;;  %v1512_v15 = vld [vmem:[#allocation22 + $0x8] sm:$0xff] (!%p1858_p1)  ;;  %v1513_v19 = vld [vmem:[#allocation22 + $0x10] sm:$0xff] (!%p1858_p1) }
 0x634   : > { %v1456_v40 = vadd.f32 %v1455_v28, %v1454_v18  ;;  %v1440_v44 = vadd.f32 %v1439_v33, %v1438_v22  ;;  %v1434_v3 = vadd.f32 %v1433_v34, %v1432_v23  ;;  %v2885_v16 = vmov (!%p1858_p1), 0   ;;  %v1514_v20 = vld [vmem:[#allocation22 + $0x18] sm:$0xff] (!%p1858_p1)  ;;  %v1515_v21 = vld [vmem:[#allocation22 + $0x20] sm:$0xff] (!%p1858_p1)  ;;  %v1516_v22 = vld [vmem:[#allocation22 + $0x28] sm:$0xff] (!%p1858_p1) }
 0x635   : > { %v1449_v29 = vrot.slane %v1448_v25, 2  ;;  %v1459_v31 = vrot.slane %v1426_v26, 4  ;;  %v1445_v36 = vrot.slane %v1444_v24, 1  ;;  %v1467_v42 = vrot.slane %v1466_v30, 2  ;;  %2454 = vset.pattern.permute.xlu0 (!%p1858_p1), %v2885_v16  ;;  %v1519_v28 = vld [vmem:[#allocation22 + $0x40] sm:$0xff] (!%p1858_p1)  ;;  %v1522_v33 = vld [vmem:[#allocation22 + $0x58] sm:$0xff] (!%p1858_p1) }
 0x636   : > { %v1412_v32 = vpop.permute.xlu1 %1411  ;;  %v1457_v50 = vrot.slane %v1456_v40, 1  ;;  %v1485_v53 = vsel %vm1309_vm2, %v1440_v44, %v1434_v3  ;;  %v2886_v17 = vmov (!%p1858_p1), 0.0|0.0   ;;  %v2223_v18 = vpack.c.bf16 (!%p1858_p1), %v1512_v15, %v1511_v10 }
 0x637   : > { %v1428_v35 = vmul.f32 %v1420_v27, %v1412_v32  ;;  %v1450_v37 = vadd.f32 %v1449_v29, %v1448_v25  ;;  %v1460_v38 = vadd.f32 %v1459_v31, %v1426_v26  ;;  %v1446_v6 = vadd.f32 %v1445_v36, %v1444_v24  ;;  %2222 = vmatprep.subr.bf16.mxu0 (!%p1858_p1), %v2886_v17  ;;  %v1517_v24 = vld [vmem:[#allocation22 + $0x30] sm:$0xff] (!%p1858_p1)  ;;  %v1518_v25 = vld [vmem:[#allocation22 + $0x38] sm:$0xff] (!%p1858_p1)  ;;  %v1520_v29 = vld [vmem:[#allocation22 + $0x48] sm:$0xff] (!%p1858_p1) }
 0x638   : > { %v1468_v51 = vadd.f32 %v1467_v42, %v1466_v30  ;;  %v1458_v58 = vadd.f32 %v1457_v50, %v1456_v40  ;;  %2224 = vmatpush3.bf16.msra.mxu0 (!%p1858_p1), %v2223_v18  ;;  %v2226_v49 = vpack.c.bf16 (!%p1858_p1), %v1514_v20, %v1513_v19  ;;  %v2229_v23 = vpack.c.bf16 (!%p1858_p1), %v1516_v22, %v1515_v21  ;;  %v1521_v32 = vld [vmem:[#allocation22 + $0x50] sm:$0xff] (!%p1858_p1)  ;;  %v1524_v36 = vld [vmem:[#allocation22 + $0x68] sm:$0xff] (!%p1858_p1)  ;;  %v1509_v42 = vld [vmem:[#allocation3] sm:$0xff] (!%p1858_p1) }
 0x639   : > { %v1471_v39 = vrot.slane %v1428_v35, 4  ;;  %v1451_v41 = vrot.slane %v1450_v37, 1  ;;  %v1461_v43 = vrot.slane %v1460_v38, 2  ;;  %v1486_v55 = vsel %vm1311_vm3, %v1446_v6, %v1485_v53  ;;  %2225 = vmatprep.subr.bf16.mxu0 (!%p1858_p1), %v2886_v17 }
 0x63a   : > { %v1469_v59 = vrot.slane %v1468_v51, 1  ;;  %v2232_v27 = vpack.c.bf16 (!%p1858_p1), %v1518_v25, %v1517_v24  ;;  %v2235_v30 = vpack.c.bf16 (!%p1858_p1), %v1520_v29, %v1519_v28  ;;  %v2888_v31 = vmov (!%p1858_p1), 0.0  }
 0x63b   : > { %v1472_v45 = vadd.f32 %v1471_v39, %v1428_v35  ;;  %v1462_v46 = vadd.f32 %v1461_v43, %v1460_v38  ;;  %v1452_v47 = vadd.f32 %v1451_v41, %v1450_v37  ;;  %2123 = vmatprep.mubr.msk.f32.mxu0 (!%p1858_p1), %vm2887_vm12, %v2888_v31  ;;  %v2238_v34 = vpack.c.bf16 (!%p1858_p1), %v1522_v33, %v1521_v32  ;;  %v1523_v35 = vld [vmem:[#allocation22 + $0x60] sm:$0xff] (!%p1858_p1)  ;;  %v1525_v38 = vld [vmem:[#allocation22 + $0x70] sm:$0xff] (!%p1858_p1)  ;;  %v1526_v39 = vld [vmem:[#allocation22 + $0x78] sm:$0xff] (!%p1858_p1) }
 0x63c   : > { %v1470_v2 = vadd.f32 %v1469_v59, %v1468_v51  ;;  %2227 = vmatpush3.bf16.msra.mxu0 (!%p1858_p1), %v2226_v49  ;;  %v2241_v37 = vpack.c.bf16 (!%p1858_p1), %v1524_v36, %v1523_v35  ;;  %v2244_v40 = vpack.c.bf16 (!%p1858_p1), %v1526_v39, %v1525_v38 }
 0x63d   : > { %v1473_v48 = vrot.slane %v1472_v45, 2  ;;  %v1463_v52 = vrot.slane %v1462_v46, 1  ;;  %v1487_v56 = vsel %vm1313_vm4, %v1452_v47, %v1486_v55  ;;  %2228 = vmatprep.subr.bf16.mxu0 (!%p1858_p1), %v2886_v17 }
 0x63e   : > { %v1488_v61 = vsel %vm1315_vm5, %v1458_v58, %v1487_v56 }
 0x63f   : > { %v1474_v54 = vadd.f32 %v1473_v48, %v1472_v45  ;;  %v1464_v57 = vadd.f32 %v1463_v52, %v1462_v46  ;;  %v1859_v45 = vld [vmem:[%s3804_s16] ss:$0 sm:$0xff] (!%p1858_p1) }
 0x640   : > { %2230 = vmatpush3.bf16.msra.mxu0 (!%p1858_p1), %v2229_v23 }
 0x641   : > { %v1475_v0 = vrot.slane %v1474_v54, 1  ;;  %v1489_v1 = vsel %vm1317_vm6, %v1464_v57, %v1488_v61  ;;  %2231 = vmatprep.subr.bf16.mxu0 (!%p1858_p1), %v2886_v17 }
 0x642   : > { %v1490_v5 = vsel %vm1319_vm7, %v1470_v2, %v1489_v1 }
 0x643   : > { %v1476_v62 = vadd.f32 %v1475_v0, %v1474_v54 }
 0x644   : > { %2233 = vmatpush3.bf16.msra.mxu0 (!%p1858_p1), %v2232_v27 }
 0x645   : > { %v1491_v8 = vsel %vm1321_vm8, %v1476_v62, %v1490_v5  ;;  %2234 = vmatprep.subr.bf16.mxu0 (!%p1858_p1), %v2886_v17 }
 0x647   : > { %v1354_v4 = vpop.permute.xlu1 %1353 }
 0x648   : > { %v1356_v7 = vmul.f32 %v1354_v4, %v1350_v63  ;;  %2236 = vmatpush3.bf16.msra.mxu0 (!%p1858_p1), %v2235_v30 }
 0x649   : > { %2237 = vmatprep.subr.bf16.mxu0 (!%p1858_p1), %v2886_v17 }
 0x64a   : > { %v1493_v9 = vadd.f32 %v1491_v8, %v1356_v7 }
 0x64c   : > { %1494 = vst [vmem:[#allocation7] sm:$0xff] %v1493_v9  ;;  %2239 = vmatpush3.bf16.msra.mxu0 (!%p1858_p1), %v2238_v34 }
 0x64d   : > { %2240 = vmatprep.subr.bf16.mxu0 (!%p1858_p1), %v2886_v17 }
 0x650   : > { %2242 = vmatpush3.bf16.msra.mxu0 (!%p1858_p1), %v2241_v37 }
 0x651   : > { %2243 = vmatprep.subr.bf16.mxu0 (!%p1858_p1), %v2886_v17 }
 0x653   : > { %v1500_v41 = vld [vmem:[#allocation7] sm:$0xff] (!%p1858_p1) }
 0x654   : > { %2245 = vmatpush3.bf16.msra.mxu0 (!%p1858_p1), %v2244_v40 }
 0x665   : > { %1499 = sbr.rel (%p1858_p1) target bundleno = 2020 (0x7e4), region = 124 }
 0x668   : > { %v1346_v12 = vpop.xlane.xlu0 %1345 }
 0x669   : > { %v1347_v13 = vadd.f32 %v1346_v12, %v1343_v60 }
 0x66b   : > { %1349 = vst.msk [vmem:[#allocation6] sm:$0xff] %vm1348_vm11, %v1347_v13 }
 0x672   : > { %v1501_v14 = vld [vmem:[#allocation6] sm:$0xff] }
 0x673   : > { %2455 = vrcp.f32 %v1501_v14 }
 0x67d   : > { %v2456_v26 = vpop.eup %2455 }
 0x67e   : > { %1505 = vperm.xlu0 %2454, %v2456_v26  }
 0x6fd   : > { %v1506_v43 = vpop.permute.xlu0 %1505 }
 0x6fe   : > { %v1508_v44 = vmul.f32 %v1506_v43, %v1500_v41 }
 0x700   : > { %v1510_v3 = vadd.f32 %v1509_v42, %v1508_v44 }
 0x702   : > { %2124 = vmatmul.mubr.f32.vlgmr.msra.gmra.mrb[0].mxu0 %v1510_v3 }
 0x7d5   : > { %v1600_v6 = vpop.f32.mrb[0].mxu0 }
 0x7d6   : > { %v1601_v46 = vadd.f32 %v1859_v45, %v1600_v6  ;;  %v2125_v47 = vpop.f32.mrb[1].mxu0 }
 0x7d8   : > { %2457 = vtanh.f32 %v1601_v46 }
 0x7e2   : > { %v2458_v48 = vpop.eup %2457 }
 0x7e3   : > { %1605 = vst [vmem:[%s715_s25] sm:$0xff] %v2458_v48 }
 0x7e4 PF: > { %s3805_s5 = sld [smem:[#allocation34_spill]]  ;;  %s3806_s6 = sld [smem:[#allocation40_spill]] }
 0x7e5   : > { %s3807_s13 = sld [smem:[#allocation56_spill]]  ;;  %s1620_s10 = sshll.u32 %s715_s25, 4  ;;  %s1621_s10 = int_to_ptr.vmem [resolvable:$true] %s1620_s10 }
 0x7e6   : > { %s1607_s14 = scalar_lea.sflag [#allocation10], %s3442_s11  ;;  %s2719_s24 = scalar_lea.vmem %s1621_s10, 128 }
 0x7e7   : > { %p2720_p6 = scmp.ne.s32.totalorder %s1621_s10, %s2719_s24  ;;  %s2889_s18 = smov [#allocation23]  }
 0x7e8   : > { %s2723_s29 = sshll.u32 %s2889_s18, 4  ;;  %s2724_s29 = int_to_ptr.vmem [resolvable:$false] %s2723_s29 }
 0x7e9   : > { %s2725_s17 = scalar_lea.vmem %s2724_s29, 256  ;;  %p2726_p13 = scmp.lt.s32.totalorder %s1621_s10, %s2724_s29 }
 0x7ea   : > { %s1861_s3 = sshll.u32 %s3805_s5, 7  ;;  %p3808_p7 = scmp.ne.s32.totalorder %s3806_s6, 0 }
 0x7eb   : > { %s3622_s2 = scalar_lea.hbm %s3807_s13, %s1861_s3  ;;  %p2727_p4 = scmp.lt.s32.totalorder %s2725_s17, %s2719_s24 }
 0x7ec   : > { %p2721_p5 = pnand %p2720_p6, %p3808_p7 }
 0x7ed   : > { %p2728_p9 = por %p2727_p4, %p2726_p13 }
 0x7ee   : > { %p2722_p10 = pneg %p2721_p5 }
 0x7f0   : > { %p2729_p3 = pnand %p2728_p9, %p2722_p10 }
 0x7f2   : > { %2732 = shalt.err (!%p2729_p3)
}
 0x7f3   : > { %s2733_s11 = scalar_lea.hbm %s3622_s2, 128  ;;  %s2737_s15 = scalar_lea.hbm %s3807_s13, 256 }
 0x7f4   : > { %p2734_p0 = scmp.ne.s32.totalorder %s3622_s2, %s2733_s11  ;;  %p2738_p2 = scmp.lt.u32.totalorder %s3622_s2, %s3807_s13 }
 0x7f5   : > { %p2739_p11 = scmp.lt.u32.totalorder %s2737_s15, %s2733_s11  ;;  %p2741_p6 = scmp.lt.u32.totalorder %s2733_s11, %s3622_s2 }
 0x7f6   : > { %p2735_p8 = pnand %p2734_p0, %p3808_p7 }
 0x7f7   : > { %p2740_p1 = por %p2739_p11, %p2738_p2 }
 0x7f8   : > { %p2736_p12 = pneg %p2735_p8 }
 0x7f9   : > { %p2742_p5 = por %p2741_p6, %p2740_p1 }
 0x7fb   : > { %p2743_p10 = pnand %p2742_p5, %p2736_p12 }
 0x7fd   : > { %2746 = shalt.err (!%p2743_p10)
}
 0x7fe   : > { %2274 = dma.vmem_to_hbm [thread:$0]  (%p3808_p7), %s1621_s10, 128, %s3622_s2, %s1607_s14  }
 0x7ff PF: > { %s3809_s1 = sld [smem:[#allocation32_spill]]  ;;  %s3810_s16 = sld [smem:[#allocation41_spill]] }
 0x800   : > { %p2320_p13 = scmp.ge.s32.totalorder %s2865_s28, 2 }
 0x805   : > { %s1632_s5 = sand.u32 1, %s3809_s1   ;;  %p3811_p4 = scmp.ne.s32.totalorder %s3810_s16, 0 }
 0x806   : > { %s1633_s3 = scalar_lea.sflag [#allocation10], %s1632_s5 }
 0x807   : > { %p2306_p9 = pnand %p2320_p13, %p3811_p4 }
 0x809   : > { %2820 = dma.done.wait (!%p2306_p9), %s1633_s3, 128  }
 0x80a   : > { %2822 = vsyncadd (!%p2306_p9), %s1633_s3, 4294967168  ;;  %s39_s28 = sadd.s32 1, %s2865_s28   ;;  %s3812_s30 = sld [smem:[#allocation39_spill]] }
 0x80b   : > { %p36_p3 = scmp.ge.s32.totalorder %s39_s28, 6   ;;  %s3813_s6 = sld [smem:[#allocation38_spill]] }
 0x80c   : > { %s3814_s7 = sld [smem:[#allocation36_spill]]  ;;  %s3815_s2 = sld [smem:[#allocation37_spill]] }
 0x80d   : > { %s3816_s18 = smov %s2829_s19  ;;  %s3817_s19 = smov %s2833_s20 }
 0x80e   : > { %s3819_s21 = smov %s2841_s22  ;;  %s3820_s22 = smov %s2845_s23 }
 0x80f   : > { %s3822_s24 = smov %s2857_s26  ;;  %s3823_s25 = smov %s2861_s27 }
 0x810   : > { %s3818_s20 = smov %s3812_s30  ;;  %38 = sbr.rel (!%p36_p3) target bundleno = 31 (0x1f), region = 190 }
 0x811   : > { %s3821_s23 = smov %s3813_s6 }
 0x812   : > { %s3824_s26 = smov %s3814_s7  ;;  %s3825_s27 = smov %s3815_s2 }
 0x817   :  { %1638 = vsyncpa [#allocation9], 1 }
 0x818   :  { %1640 = vsyncpa [#allocation9 + $0x1], 1 }
 0x819   :  { %1641 = vsyncpa [#allocation12], 1 }
 0x81a   :  { %1643 = vsyncpa [#allocation12 + $0x1], 1 }
 0x81b   :  { %1644 = vsyncpa [#allocation15], 1 }
 0x81c   :  { %1646 = vsyncpa [#allocation15 + $0x1], 1 }
 0x81d   :  { %1647 = vsyncpa [#allocation18], 1 }
 0x81e   :  { %1648 = vsyncpa [#allocation21], 1 }
 0x81f   :  { %1649 = vsyncpa [#allocation10], 1 }
 0x820   :  { %1651 = vsyncpa [#allocation10 + $0x1], 1 }

</bundles_post_ra>
